<compile_context>
chip_gen: v6e
topology: v6e:2x2x1
jax: 0.10.0
libtpu: 0.0.40
codegen_flags: <defaults>
</compile_context>

<pallas_src>
import jax
import jax.numpy as jnp
from jax.experimental import pallas as pl
from jax.experimental.pallas import tpu as pltpu

IN_DIM = 28 * 28          # 784
OUT_DIM = 10
OUT_PAD = 128             # lane-dense output width
HID = (512, 256, 128)


def mlp_kernel(x_ref,
               w1_ref, b1_ref,
               w2_ref, b2_ref,
               w3_ref, b3_ref,
               w4_ref, b4_ref,
               o_ref):
    # Layer 1: Linear(784->512) with BN scale pre-folded into W + shift + ReLU
    h = jnp.dot(x_ref[...], w1_ref[...], preferred_element_type=jnp.float32)
    h = jnp.maximum(h + b1_ref[...], 0.0).astype(jnp.bfloat16)
    # Layer 2: Linear(512->256) + shift + ReLU
    h = jnp.dot(h, w2_ref[...], preferred_element_type=jnp.float32)
    h = jnp.maximum(h + b2_ref[...], 0.0).astype(jnp.bfloat16)
    # Layer 3: Linear(256->128) + shift + ReLU
    h = jnp.dot(h, w3_ref[...], preferred_element_type=jnp.float32)
    h = jnp.maximum(h + b3_ref[...], 0.0).astype(jnp.bfloat16)
    # Layer 4: Linear(128->128 padded); cols >= 10 have zero weight/bias.
    out = jnp.dot(h, w4_ref[...], preferred_element_type=jnp.float32) + b4_ref[...]
    o_ref[...] = out.astype(o_ref.dtype)


def _round_up(a, m):
    return ((a + m - 1) // m) * m


def mnist_classifier_forward(x_nchw, params, *, tile_b=2048):
    """x_nchw: (B, 1, 28, 28) float32. Returns logits (B, 10) float32."""
    B = x_nchw.shape[0]
    w1, b1, w2, b2, w3, b3, w4, b4 = params

    # nn.Flatten (row-major, matches PyTorch); cast to bf16, no K padding.
    x = x_nchw.reshape(B, IN_DIM).astype(jnp.bfloat16)

    # Batch tiling: 16-row alignment (bf16 sublane packing). When the batch is
    # large enough, cap the tile at ceil(b_pad/2) so the grid has >= 2
    # "parallel" programs and v7x's second TensorCore gets work.
    b16 = _round_up(B, 16)
    if b16 >= 32:
        tb = min(tile_b, _round_up(pl.cdiv(b16, 2), 16))
    else:
        tb = b16
    b_pad = _round_up(b16, tb)
    if b_pad != B:
        x = jnp.pad(x, ((0, b_pad - B), (0, 0)))

    grid = (b_pad // tb,)

    def const_spec(arr):
        # Full-array block, constant block index -> stays resident in VMEM
        # across grid steps (no re-DMA).
        return pl.BlockSpec(arr.shape, lambda i: (0,) * arr.ndim)

    in_specs = [pl.BlockSpec((tb, IN_DIM), lambda i: (i, 0))] + [
        const_spec(a) for a in (w1, b1, w2, b2, w3, b3, w4, b4)
    ]
    out_specs = pl.BlockSpec((tb, OUT_PAD), lambda i: (i, 0))

    # Rough cost hint for the XLA scheduler.
    mac = IN_DIM * HID[0] + HID[0] * HID[1] + HID[1] * HID[2] + HID[2] * OUT_PAD
    weight_bytes = 2 * mac + 4 * (sum(HID) + OUT_PAD)
    cost = pl.CostEstimate(
        flops=2 * b_pad * mac,
        transcendentals=0,
        bytes_accessed=weight_bytes + b_pad * IN_DIM * 2 + b_pad * OUT_PAD * 4,
    )

    out = pl.pallas_call(
        mlp_kernel,
        out_shape=jax.ShapeDtypeStruct((b_pad, OUT_PAD), jnp.float32),
        grid=grid,
        in_specs=in_specs,
        out_specs=out_specs,
        compiler_params=pltpu.CompilerParams(
            dimension_semantics=("parallel",),
            vmem_limit_bytes=32 * 1024 * 1024,
        ),
        cost_estimate=cost,
    )(x, w1, b1, w2, b2, w3, b3, w4, b4)

    return out[:B, :OUT_DIM]


def init_params(key):
    """Deterministic parameter init. For layers 1-3, BatchNorm (gamma, beta,
    running mean/var) is folded:
        scale = gamma / sqrt(var + eps)   -> folded into W columns (before bf16)
        shift = (lin_b - mean) * scale + beta
    Weights stored bf16 in (in_dim, out_dim) layout (x @ W == PyTorch x @ W.T).
    Last layer zero-padded along N from 10 to 128 (lane-dense output)."""
    dims = [(IN_DIM, HID[0]), (HID[0], HID[1]), (HID[1], HID[2]), (HID[2], OUT_DIM)]
    keys = jax.random.split(key, 16)
    ki = iter(range(16))
    eps = 1e-5

    params = []
    for li, (din, dout) in enumerate(dims):
        bound = 1.0 / jnp.sqrt(din)
        w = jax.random.uniform(keys[next(ki)], (din, dout), jnp.float32,
                               -bound, bound)
        lin_b = jax.random.uniform(keys[next(ki)], (dout,), jnp.float32,
                                   -bound, bound)
        if li < 3:
            # BatchNorm1d(dout) parameters / running stats (deterministic).
            gamma = 1.0 + 0.01 * jax.random.normal(keys[next(ki)], (dout,),
                                                   jnp.float32)
            beta = 0.01 * jax.random.normal(keys[next(ki)], (dout,),
                                            jnp.float32)
            run_mean = jnp.zeros((dout,), jnp.float32)
            run_var = jnp.ones((dout,), jnp.float32)
            scale = gamma / jnp.sqrt(run_var + eps)
            shift = (lin_b - run_mean) * scale + beta
            w = w * scale[None, :]                      # fold scale into W (f32)
            params += [w.astype(jnp.bfloat16),
                       shift.reshape(1, dout).astype(jnp.float32)]
        else:
            # Pad N: 10 -> 128 with zero columns / zero bias entries.
            w = jnp.pad(w, ((0, 0), (0, OUT_PAD - dout)))
            lin_b = jnp.pad(lin_b, (0, OUT_PAD - dout))
            params += [w.astype(jnp.bfloat16),
                       lin_b.reshape(1, OUT_PAD).astype(jnp.float32)]
    return tuple(params)


if __name__ == "__main__":
    key = jax.random.PRNGKey(0)
    k_x, k_p = jax.random.split(key)

    B = 8
    x = jax.random.normal(k_x, (B, 1, 28, 28), jnp.float32)  # NCHW like PyTorch
    params = init_params(k_p)

    logits = mnist_classifier_forward(x, params)
    jax.block_until_ready(logits)

    assert logits.shape == (B, OUT_DIM) and logits.dtype == jnp.float32
    assert bool(jnp.all(jnp.isfinite(logits)))
    print("KERNEL_OK")
</pallas_src>

<mosaic_0001>
module attributes {stable_mosaic.version = 11 : i64} {
  func.func @mlp_kernel(%arg0: i32, %arg1: memref<16x784xbf16, #tpu.memory_space<vmem>>, %arg2: memref<784x512xbf16, #tpu.memory_space<vmem>>, %arg3: memref<1x512xf32, #tpu.memory_space<vmem>>, %arg4: memref<512x256xbf16, #tpu.memory_space<vmem>>, %arg5: memref<1x256xf32, #tpu.memory_space<vmem>>, %arg6: memref<256x128xbf16, #tpu.memory_space<vmem>>, %arg7: memref<1x128xf32, #tpu.memory_space<vmem>>, %arg8: memref<128x128xbf16, #tpu.memory_space<vmem>>, %arg9: memref<1x128xf32, #tpu.memory_space<vmem>>, %arg10: memref<16x128xf32, #tpu.memory_space<vmem>>) attributes {dimension_semantics = [#tpu.dimension_semantics<parallel>], iteration_bounds = array<i64: 1>, scalar_prefetch = 0 : i64, scratch_operands = 0 : i64, tpu.core_type = #tpu.core_type<tc>, window_params = [{transform_indices = @transform_0, window_bounds = array<i64: 16, 784>}, {pipeline_mode = #tpu.pipeline_mode<synchronous>, transform_indices = @transform_1, window_bounds = array<i64: 784, 512>}, {pipeline_mode = #tpu.pipeline_mode<synchronous>, transform_indices = @transform_2, window_bounds = array<i64: 1, 512>}, {pipeline_mode = #tpu.pipeline_mode<synchronous>, transform_indices = @transform_3, window_bounds = array<i64: 512, 256>}, {pipeline_mode = #tpu.pipeline_mode<synchronous>, transform_indices = @transform_4, window_bounds = array<i64: 1, 256>}, {pipeline_mode = #tpu.pipeline_mode<synchronous>, transform_indices = @transform_5, window_bounds = array<i64: 256, 128>}, {pipeline_mode = #tpu.pipeline_mode<synchronous>, transform_indices = @transform_6, window_bounds = array<i64: 1, 128>}, {pipeline_mode = #tpu.pipeline_mode<synchronous>, transform_indices = @transform_7, window_bounds = array<i64: 128, 128>}, {pipeline_mode = #tpu.pipeline_mode<synchronous>, transform_indices = @transform_8, window_bounds = array<i64: 1, 128>}, {transform_indices = @transform_9, window_bounds = array<i64: 16, 128>}]} {
    %c0 = arith.constant 0 : index
    %c0_0 = arith.constant 0 : index
    %0 = vector.load %arg1[%c0, %c0_0] : memref<16x784xbf16, #tpu.memory_space<vmem>>, vector<16x784xbf16>
    %c0_1 = arith.constant 0 : index
    %c0_2 = arith.constant 0 : index
    %1 = vector.load %arg2[%c0_1, %c0_2] : memref<784x512xbf16, #tpu.memory_space<vmem>>, vector<784x512xbf16>
    %cst = arith.constant dense<0.000000e+00> : vector<16x512xf32>
    %2 = tpu.matmul %0, %1, %cst {dimension_numbers = #tpu.dot_dimension_numbers<[1], [0], [0], [1], [0, 0, 1, 1], [], []>} : vector<16x784xbf16>, vector<784x512xbf16>, vector<16x512xf32> -> vector<16x512xf32>
    %c0_3 = arith.constant 0 : index
    %c0_4 = arith.constant 0 : index
    %3 = vector.load %arg3[%c0_3, %c0_4] : memref<1x512xf32, #tpu.memory_space<vmem>>, vector<1x512xf32>
    %4 = vector.broadcast %3 : vector<1x512xf32> to vector<16x512xf32>
    %5 = arith.addf %2, %4 : vector<16x512xf32>
    %cst_5 = arith.constant 0.000000e+00 : f32
    %6 = vector.broadcast %cst_5 : f32 to vector<16x512xf32>
    %7 = arith.maximumf %5, %6 : vector<16x512xf32>
    %8 = arith.truncf %7 : vector<16x512xf32> to vector<16x512xbf16>
    %c0_6 = arith.constant 0 : index
    %c0_7 = arith.constant 0 : index
    %9 = vector.load %arg4[%c0_6, %c0_7] : memref<512x256xbf16, #tpu.memory_space<vmem>>, vector<512x256xbf16>
    %cst_8 = arith.constant dense<0.000000e+00> : vector<16x256xf32>
    %10 = tpu.matmul %8, %9, %cst_8 {dimension_numbers = #tpu.dot_dimension_numbers<[1], [0], [0], [1], [0, 0, 1, 1], [], []>} : vector<16x512xbf16>, vector<512x256xbf16>, vector<16x256xf32> -> vector<16x256xf32>
    %c0_9 = arith.constant 0 : index
    %c0_10 = arith.constant 0 : index
    %11 = vector.load %arg5[%c0_9, %c0_10] : memref<1x256xf32, #tpu.memory_space<vmem>>, vector<1x256xf32>
    %12 = vector.broadcast %11 : vector<1x256xf32> to vector<16x256xf32>
    %13 = arith.addf %10, %12 : vector<16x256xf32>
    %cst_11 = arith.constant 0.000000e+00 : f32
    %14 = vector.broadcast %cst_11 : f32 to vector<16x256xf32>
    %15 = arith.maximumf %13, %14 : vector<16x256xf32>
    %16 = arith.truncf %15 : vector<16x256xf32> to vector<16x256xbf16>
    %c0_12 = arith.constant 0 : index
    %c0_13 = arith.constant 0 : index
    %17 = vector.load %arg6[%c0_12, %c0_13] : memref<256x128xbf16, #tpu.memory_space<vmem>>, vector<256x128xbf16>
    %cst_14 = arith.constant dense<0.000000e+00> : vector<16x128xf32>
    %18 = tpu.matmul %16, %17, %cst_14 {dimension_numbers = #tpu.dot_dimension_numbers<[1], [0], [0], [1], [0, 0, 1, 1], [], []>} : vector<16x256xbf16>, vector<256x128xbf16>, vector<16x128xf32> -> vector<16x128xf32>
    %c0_15 = arith.constant 0 : index
    %c0_16 = arith.constant 0 : index
    %19 = vector.load %arg7[%c0_15, %c0_16] : memref<1x128xf32, #tpu.memory_space<vmem>>, vector<1x128xf32>
    %20 = vector.broadcast %19 : vector<1x128xf32> to vector<16x128xf32>
    %21 = arith.addf %18, %20 : vector<16x128xf32>
    %cst_17 = arith.constant 0.000000e+00 : f32
    %22 = vector.broadcast %cst_17 : f32 to vector<16x128xf32>
    %23 = arith.maximumf %21, %22 : vector<16x128xf32>
    %24 = arith.truncf %23 : vector<16x128xf32> to vector<16x128xbf16>
    %c0_18 = arith.constant 0 : index
    %c0_19 = arith.constant 0 : index
    %25 = vector.load %arg8[%c0_18, %c0_19] : memref<128x128xbf16, #tpu.memory_space<vmem>>, vector<128x128xbf16>
    %cst_20 = arith.constant dense<0.000000e+00> : vector<16x128xf32>
    %26 = tpu.matmul %24, %25, %cst_20 {dimension_numbers = #tpu.dot_dimension_numbers<[1], [0], [0], [1], [0, 0, 1, 1], [], []>} : vector<16x128xbf16>, vector<128x128xbf16>, vector<16x128xf32> -> vector<16x128xf32>
    %c0_21 = arith.constant 0 : index
    %c0_22 = arith.constant 0 : index
    %27 = vector.load %arg9[%c0_21, %c0_22] : memref<1x128xf32, #tpu.memory_space<vmem>>, vector<1x128xf32>
    %28 = vector.broadcast %27 : vector<1x128xf32> to vector<16x128xf32>
    %29 = arith.addf %26, %28 : vector<16x128xf32>
    %c0_23 = arith.constant 0 : index
    %c0_24 = arith.constant 0 : index
    %30 = vector.load %arg10[%c0_23, %c0_24] : memref<16x128xf32, #tpu.memory_space<vmem>>, vector<16x128xf32>
    tpu.vector_store %arg10[%c0_23, %c0_24], %29 {strides = array<i32>} : memref<16x128xf32, #tpu.memory_space<vmem>>, vector<16x128xf32>,
    return
  }
  func.func @transform_0(%arg0: i32) -> (i32, i32) {
    %c0_i32 = arith.constant 0 : i32
    %c0_i32_0 = arith.constant 0 : i32
    return %arg0, %c0_i32 : i32, i32
  }
  func.func @transform_1(%arg0: i32) -> (i32, i32) {
    %c0_i32 = arith.constant 0 : i32
    %c0_i32_0 = arith.constant 0 : i32
    %c0_i32_1 = arith.constant 0 : i32
    return %c0_i32, %c0_i32_0 : i32, i32
  }
  func.func @transform_2(%arg0: i32) -> (i32, i32) {
    %c0_i32 = arith.constant 0 : i32
    %c0_i32_0 = arith.constant 0 : i32
    %c0_i32_1 = arith.constant 0 : i32
    return %c0_i32, %c0_i32_0 : i32, i32
  }
  func.func @transform_3(%arg0: i32) -> (i32, i32) {
    %c0_i32 = arith.constant 0 : i32
    %c0_i32_0 = arith.constant 0 : i32
    %c0_i32_1 = arith.constant 0 : i32
    return %c0_i32, %c0_i32_0 : i32, i32
  }
  func.func @transform_4(%arg0: i32) -> (i32, i32) {
    %c0_i32 = arith.constant 0 : i32
    %c0_i32_0 = arith.constant 0 : i32
    %c0_i32_1 = arith.constant 0 : i32
    return %c0_i32, %c0_i32_0 : i32, i32
  }
  func.func @transform_5(%arg0: i32) -> (i32, i32) {
    %c0_i32 = arith.constant 0 : i32
    %c0_i32_0 = arith.constant 0 : i32
    %c0_i32_1 = arith.constant 0 : i32
    return %c0_i32, %c0_i32_0 : i32, i32
  }
  func.func @transform_6(%arg0: i32) -> (i32, i32) {
    %c0_i32 = arith.constant 0 : i32
    %c0_i32_0 = arith.constant 0 : i32
    %c0_i32_1 = arith.constant 0 : i32
    return %c0_i32, %c0_i32_0 : i32, i32
  }
  func.func @transform_7(%arg0: i32) -> (i32, i32) {
    %c0_i32 = arith.constant 0 : i32
    %c0_i32_0 = arith.constant 0 : i32
    %c0_i32_1 = arith.constant 0 : i32
    return %c0_i32, %c0_i32_0 : i32, i32
  }
  func.func @transform_8(%arg0: i32) -> (i32, i32) {
    %c0_i32 = arith.constant 0 : i32
    %c0_i32_0 = arith.constant 0 : i32
    %c0_i32_1 = arith.constant 0 : i32
    return %c0_i32, %c0_i32_0 : i32, i32
  }
  func.func @transform_9(%arg0: i32) -> (i32, i32) {
    %c0_i32 = arith.constant 0 : i32
    %c0_i32_0 = arith.constant 0 : i32
    return %arg0, %c0_i32 : i32, i32
  }
}

</mosaic_0001>

<bundles_post_ra>
// kernel: tpu_custom_call.1
= control target key start
LH: loop header
LB: loop body
LE: loop exit
PB: predicated region body
PF: predicated region fallthrough
CT: control target
= control target key end

     0   :  { %14 = vsyncpa [#allocation3], 0  ;;  %s3604_s0 = inlined_call_operand.hbm [shape: bf16[16,784], index: 0, kind: input, shape index: {}]   ;;  %s3605_s1 = inlined_call_operand.hbm [shape: bf16[784,512], index: 1, kind: input, shape index: {}]   ;;  %s3606_s2 = inlined_call_operand.hbm [shape: f32[1,512], index: 2, kind: input, shape index: {}]   ;;  %s3607_s3 = inlined_call_operand.hbm [shape: bf16[512,256], index: 3, kind: input, shape index: {}]   ;;  %s3608_s4 = inlined_call_operand.vmem [shape: f32[1,256], index: 4, kind: input, shape index: {}]   ;;  %s3609_s5 = inlined_call_operand.hbm [shape: bf16[256,128], index: 5, kind: input, shape index: {}]   ;;  %s3610_s6 = inlined_call_operand.vmem [shape: f32[1,128], index: 6, kind: input, shape index: {}]   ;;  %s3611_s7 = inlined_call_operand.hbm [shape: bf16[128,128], index: 7, kind: input, shape index: {}]   ;;  %s3612_s8 = inlined_call_operand.vmem [shape: f32[1,128], index: 8, kind: input, shape index: {}]   ;;  %s3613_s9 = inlined_call_operand.hbm [shape: f32[16,128], index: 9, kind: output, shape index: {}]  }
   0x1   :  { %15 = vsyncpa [#allocation6], 0 }
   0x2   :  { %16 = vsyncpa [#allocation9], 0 }
   0x3   :  { %17 = vsyncpa [#allocation12], 0 }
   0x4   :  { %18 = vsyncpa [#allocation4], 0  ;;  %s3454_s30 = smov [#allocation5]  }
   0x5   :  { %s36_s10 = sshll.u32 %s3454_s30, 4  ;;  %s37_s10 = int_to_ptr.vmem [resolvable:$true] %s36_s10 }
   0x6   :  { %s3312_s11 = scalar_lea.vmem %s37_s10, 25088  ;;  %p3317_p1 = scmp.lt.s32.totalorder %s37_s10, %s37_s10 }
   0x7   :  { %p3313_p0 = scmp.ne.s32.totalorder %s37_s10, %s3312_s11  ;;  %p3318_p2 = scmp.lt.s32.totalorder %s3312_s11, %s3312_s11 }
   0x9   :  { %p3319_p3 = por %p3318_p2, %p3317_p1 }
   0xb   :  { %p3320_p4 = pnand %p3319_p3, %p3313_p0 }
   0xd   :  { %3323 = shalt.err (!%p3320_p4)
}
   0xe   :  { %s3455_s12 = smov 256   ;;  %s3456_s13 = smov 16  }
   0xf   :  { %42 = dma.hbm_to_vmem [thread:$0]  %s3605_s1, 25088, %s37_s10, [#allocation6], %s3455_s12, %s3455_s12, %s3456_s13  }
  0x10   :  { %s3457_s16 = smov [#allocation8]  }
  0x11   :  { %s58_s17 = sshll.u32 %s3457_s16, 4  ;;  %s59_s17 = int_to_ptr.vmem [resolvable:$true] %s58_s17 }
  0x12   :  { %s3332_s18 = scalar_lea.vmem %s59_s17, 8192  ;;  %p3337_p6 = scmp.lt.s32.totalorder %s59_s17, %s59_s17 }
  0x13   :  { %p3333_p5 = scmp.ne.s32.totalorder %s59_s17, %s3332_s18  ;;  %p3338_p7 = scmp.lt.s32.totalorder %s3332_s18, %s3332_s18 }
  0x15   :  { %p3339_p8 = por %p3338_p7, %p3337_p6 }
  0x17   :  { %p3340_p9 = pnand %p3339_p8, %p3333_p5 }
  0x19   :  { %3343 = shalt.err (!%p3340_p9)
}
  0x1a   :  { %s3458_s19 = smov 128   ;;  %s3459_s20 = smov 8  }
  0x1b   :  { %64 = dma.hbm_to_vmem [thread:$0]  %s3607_s3, 8192, %s59_s17, [#allocation9], %s3458_s19, %s3458_s19, %s3459_s20  }
  0x1c   :  { %s3460_s1 = smov [#allocation2]  }
  0x1d   :  { %s24_s23 = sshll.u32 %s3460_s1, 4  ;;  %s25_s23 = int_to_ptr.vmem [resolvable:$true] %s24_s23 }
  0x1e   :  { %s3352_s24 = scalar_lea.vmem %s25_s23, 896  ;;  %p3357_p11 = scmp.lt.s32.totalorder %s25_s23, %s25_s23 }
  0x1f   :  { %p3353_p10 = scmp.ne.s32.totalorder %s25_s23, %s3352_s24  ;;  %p3358_p12 = scmp.lt.s32.totalorder %s3352_s24, %s3352_s24 }
  0x21   :  { %p3359_p13 = por %p3358_p12, %p3357_p11 }
  0x23   :  { %p3360_p0 = pnand %p3359_p13, %p3353_p10 }
  0x25   :  { %3363 = shalt.err (!%p3360_p0)
}
  0x26   :  { %s3461_s25 = smov 448   ;;  %s3462_s26 = smov 28  }
  0x27   :  { %30 = dma.hbm_to_vmem [thread:$0]  %s3604_s0, 896, %s25_s23, [#allocation3], %s3461_s25, %s3461_s25, %s3462_s26  }
  0x28   :  { %s3463_s29 = smov [#allocation7]   ;;  %s3464_s3 = smov [#allocation10]  }
  0x29   :  { %s49_s30 = sshll.u32 %s3463_s29, 4  ;;  %s72_s10 = sshll.u32 %s3464_s3, 4  ;;  %s50_s30 = int_to_ptr.vmem [resolvable:$true] %s49_s30  ;;  %s73_s10 = int_to_ptr.vmem [resolvable:$true] %s72_s10 }
  0x2a   :  { %s3372_s11 = scalar_lea.vmem %s50_s30, 64  ;;  %p3377_p2 = scmp.lt.s32.totalorder %s50_s30, %s50_s30 }
  0x2b   :  { %p3373_p1 = scmp.ne.s32.totalorder %s50_s30, %s3372_s11  ;;  %p3378_p3 = scmp.lt.s32.totalorder %s3372_s11, %s3372_s11 }
  0x2d   :  { %p3379_p4 = por %p3378_p3, %p3377_p2 }
  0x2f   :  { %p3380_p5 = pnand %p3379_p4, %p3373_p1 }
  0x31   :  { %3383 = shalt.err (!%p3380_p5)
}
  0x32   :  { %52 = dma.hbm_to_vmem [thread:$0]  %s3606_s2, 64, %s50_s30, [#allocation6]  }
  0x33   :  { %s3392_s14 = scalar_lea.vmem %s73_s10, 2048  ;;  %p3397_p7 = scmp.lt.s32.totalorder %s73_s10, %s73_s10 }
  0x34   :  { %p3393_p6 = scmp.ne.s32.totalorder %s73_s10, %s3392_s14  ;;  %p3398_p8 = scmp.lt.s32.totalorder %s3392_s14, %s3392_s14 }
  0x36   :  { %p3399_p9 = por %p3398_p8, %p3397_p7 }
  0x38   :  { %p3400_p10 = pnand %p3399_p9, %p3393_p6 }
  0x3a   :  { %3403 = shalt.err (!%p3400_p10)
}
  0x3b   :  { %s3465_s0 = smov 64   ;;  %s3466_s15 = smov 4  }
  0x3c   :  { %78 = dma.hbm_to_vmem [thread:$0]  %s3609_s5, 2048, %s73_s10, [#allocation9], %s3465_s0, %s3465_s0, %s3466_s15  }
  0x3d   :  { %s3467_s18 = smov [#allocation11]  }
  0x3e   :  { %s86_s21 = sshll.u32 %s3467_s18, 4  ;;  %s87_s21 = int_to_ptr.vmem [resolvable:$true] %s86_s21 }
  0x3f   :  { %s3412_s22 = scalar_lea.vmem %s87_s21, 1024  ;;  %p3417_p12 = scmp.lt.s32.totalorder %s87_s21, %s87_s21 }
  0x40   :  { %p3413_p11 = scmp.ne.s32.totalorder %s87_s21, %s3412_s22  ;;  %p3418_p13 = scmp.lt.s32.totalorder %s3412_s22, %s3412_s22 }
  0x42   :  { %p3419_p0 = por %p3418_p13, %p3417_p12 }
  0x44   :  { %p3420_p1 = pnand %p3419_p0, %p3413_p11 }
  0x46   :  { %3423 = shalt.err (!%p3420_p1)
}
  0x47   :  { %92 = dma.hbm_to_vmem [thread:$0]  %s3611_s7, 1024, %s87_s21, [#allocation12], %s3465_s0, %s3465_s0, %s3466_s15  }
  0x48   :  { %3444 = dma.done.wait [#allocation3], 896  }
  0x49   :  { %3445 = vsyncadd [#allocation3], 4294966400 }
  0x4a   :  { %3446 = dma.done.wait [#allocation6], 25152  }
  0x4b   :  { %3447 = vsyncadd [#allocation6], 4294942144 }
  0x4c   :  { %3448 = dma.done.wait [#allocation9], 10240  }
  0x4d   :  { %3449 = vsyncadd [#allocation9], 4294957056 }
  0x4e   :  { %3450 = dma.done.wait [#allocation12], 1024  }
  0x4f   :  { %3451 = vsyncadd [#allocation12], 4294966272  ;;  %v2880_v0 = vld [vmem:[#allocation5 + $0xe4] ss:$16 sps:$4 sm:$0xff]   ;;  %v2884_v2 = vld [vmem:[#allocation5 + $0xe0] ss:$16 sps:$4 sm:$0xff]  }
  0x50   :  { %v2882_v1 = vld [vmem:[#allocation5 + $0x2e4] ss:$16 sps:$4 sm:$0xff]   ;;  %1359 = vmatprep.subr.bf16.mxu0 %v2880_v0  ;;  %v2885_v3 = vld [vmem:[#allocation5 + $0x2e0] ss:$16 sps:$4 sm:$0xff]   ;;  %v3543_v49 = vld [vmem:[#allocation2 + $0x4] ss:$28 sps:$4 sm:$0xff]  }
  0x51   :  { %1402 = vmatprep.subr.bf16.mxu1 %v2882_v1  ;;  %v2886_v4 = vld [vmem:[#allocation5 + $0xc4] ss:$16 sps:$4 sm:$0xff]   ;;  %1360 = vmatpush1.bf16.msra.mxu0 %v2884_v2  ;;  %v2890_v6 = vld [vmem:[#allocation5 + $0xc0] ss:$16 sps:$4 sm:$0xff]   ;;  %vm1355_vm0 = vcmask 130048   ;;  %vm3470_vm1 = vmmov 0  }
  0x52   :  { %1403 = vmatpush1.bf16.msra.mxu1 %v2885_v3  ;;  %v2888_v5 = vld [vmem:[#allocation5 + $0x2c4] ss:$16 sps:$4 sm:$0xff]   ;;  %1361 = vmatprep.subr.bf16.mxu0 %v2886_v4  ;;  %v2891_v7 = vld [vmem:[#allocation5 + $0x2c0] ss:$16 sps:$4 sm:$0xff]   ;;  %s3471_s26 = smov [#allocation13]  }
  0x53   :  { %1404 = vmatprep.subr.bf16.mxu1 %v2888_v5  ;;  %v2892_v8 = vld [vmem:[#allocation5 + $0xa4] ss:$16 sps:$4 sm:$0xff]   ;;  %v2896_v10 = vld [vmem:[#allocation5 + $0xa0] ss:$16 sps:$4 sm:$0xff]   ;;  %1391 = vmatprep.mubr.bf16.mxu0 %v3543_v49  ;;  %s2501_s27 = sshll.u32 %s3471_s26, 4  ;;  %s2502_s27 = int_to_ptr.vmem [resolvable:$true] %s2501_s27 }
  0x54   :  { %v2894_v9 = vld [vmem:[#allocation5 + $0x2a4] ss:$16 sps:$4 sm:$0xff]   ;;  %v2897_v11 = vld [vmem:[#allocation5 + $0x2a0] ss:$16 sps:$4 sm:$0xff]   ;;  %p3429_p3 = scmp.lt.s32.totalorder %s2502_s27, %s2502_s27 }
  0x55   :  { %1362 = vmatpush1.bf16.msra.mxu0 %v2890_v6  ;;  %v2898_v12 = vld [vmem:[#allocation5 + $0x84] ss:$16 sps:$4 sm:$0xff]   ;;  %v2902_v14 = vld [vmem:[#allocation5 + $0x80] ss:$16 sps:$4 sm:$0xff]  }
  0x56   :  { %1405 = vmatpush1.bf16.msra.mxu1 %v2891_v7  ;;  %1363 = vmatprep.subr.bf16.mxu0 %v2892_v8  ;;  %v2900_v13 = vld [vmem:[#allocation5 + $0x284] ss:$16 sps:$4 sm:$0xff]   ;;  %v2903_v15 = vld [vmem:[#allocation5 + $0x280] ss:$16 sps:$4 sm:$0xff]  }
  0x57   :  { %1406 = vmatprep.subr.bf16.mxu1 %v2894_v9  ;;  %v2904_v16 = vld [vmem:[#allocation5 + $0x64] ss:$16 sps:$4 sm:$0xff]   ;;  %v2908_v18 = vld [vmem:[#allocation5 + $0x60] ss:$16 sps:$4 sm:$0xff]   ;;  %v2993_v9 = vld [vmem:[#allocation5 + $0xec] ss:$16 sps:$4 sm:$0xff]  }
  0x58   :  { %v2906_v17 = vld [vmem:[#allocation5 + $0x264] ss:$16 sps:$4 sm:$0xff]   ;;  %v2909_v19 = vld [vmem:[#allocation5 + $0x260] ss:$16 sps:$4 sm:$0xff]  }
  0x59   :  { %1364 = vmatpush1.bf16.msra.mxu0 %v2896_v10  ;;  %v2910_v20 = vld [vmem:[#allocation5 + $0x44] ss:$16 sps:$4 sm:$0xff]   ;;  %v2914_v22 = vld [vmem:[#allocation5 + $0x40] ss:$16 sps:$4 sm:$0xff]  }
  0x5a   :  { %1407 = vmatpush1.bf16.msra.mxu1 %v2897_v11  ;;  %1365 = vmatprep.subr.bf16.mxu0 %v2898_v12  ;;  %v2912_v21 = vld [vmem:[#allocation5 + $0x244] ss:$16 sps:$4 sm:$0xff]   ;;  %v2915_v23 = vld [vmem:[#allocation5 + $0x240] ss:$16 sps:$4 sm:$0xff]   ;;  %v3468_v11 = vmov 0  }
  0x5b   :  { %1408 = vmatprep.subr.bf16.mxu1 %v2900_v13  ;;  %v2916_v24 = vld [vmem:[#allocation5 + $0x24] ss:$16 sps:$4 sm:$0xff]   ;;  %v2920_v26 = vld [vmem:[#allocation5 + $0x20] ss:$16 sps:$4 sm:$0xff]   ;;  %v2991_v13 = vld [vmem:[#allocation5 + $0xe8] ss:$16 sps:$4 sm:$0xff]  }
  0x5c   :  { %v2918_v25 = vld [vmem:[#allocation5 + $0x224] ss:$16 sps:$4 sm:$0xff]   ;;  %v2921_v27 = vld [vmem:[#allocation5 + $0x220] ss:$16 sps:$4 sm:$0xff]  }
  0x5d   :  { %1366 = vmatpush1.bf16.msra.mxu0 %v2902_v14  ;;  %v2922_v28 = vld [vmem:[#allocation5 + $0x4] ss:$16 sps:$4 sm:$0xff]   ;;  %v2926_v30 = vld [vmem:[#allocation5] ss:$16 sps:$4 sm:$0xff]  }
  0x5e   :  { %1409 = vmatpush1.bf16.msra.mxu1 %v2903_v15  ;;  %1367 = vmatprep.subr.bf16.mxu0 %v2904_v16  ;;  %v2924_v29 = vld [vmem:[#allocation5 + $0x204] ss:$16 sps:$4 sm:$0xff]   ;;  %v2927_v31 = vld [vmem:[#allocation5 + $0x200] ss:$16 sps:$4 sm:$0xff]   ;;  %v3000_v16 = vld [vmem:[#allocation5 + $0xcc] ss:$16 sps:$4 sm:$0xff]  }
  0x5f   :  { %1410 = vmatprep.subr.bf16.mxu1 %v2906_v17  ;;  %v2928_v32 = vld [vmem:[#allocation5 + $0x1e4] ss:$16 sps:$4 sm:$0xff]   ;;  %v2932_v34 = vld [vmem:[#allocation5 + $0x1e0] ss:$16 sps:$4 sm:$0xff]  }
  0x60   :  { %v2930_v33 = vld [vmem:[#allocation5 + $0x3e4] ss:$16 sps:$4 sm:$0xff]   ;;  %v2933_v35 = vld [vmem:[#allocation5 + $0x3e0] ss:$16 sps:$4 sm:$0xff]  }
  0x61   :  { %1368 = vmatpush1.bf16.msra.mxu0 %v2908_v18  ;;  %v2934_v36 = vld [vmem:[#allocation5 + $0x1c4] ss:$16 sps:$4 sm:$0xff]   ;;  %v2938_v38 = vld [vmem:[#allocation5 + $0x1c0] ss:$16 sps:$4 sm:$0xff]   ;;  %v2998_v18 = vld [vmem:[#allocation5 + $0xc8] ss:$16 sps:$4 sm:$0xff]  }
  0x62   :  { %1411 = vmatpush1.bf16.msra.mxu1 %v2909_v19  ;;  %1369 = vmatprep.subr.bf16.mxu0 %v2910_v20  ;;  %v2936_v37 = vld [vmem:[#allocation5 + $0x3c4] ss:$16 sps:$4 sm:$0xff]   ;;  %v2939_v39 = vld [vmem:[#allocation5 + $0x3c0] ss:$16 sps:$4 sm:$0xff]   ;;  %v3006_v20 = vld [vmem:[#allocation5 + $0xac] ss:$16 sps:$4 sm:$0xff]  }
  0x63   :  { %1412 = vmatprep.subr.bf16.mxu1 %v2912_v21  ;;  %v2940_v40 = vld [vmem:[#allocation5 + $0x1a4] ss:$16 sps:$4 sm:$0xff]   ;;  %v2944_v42 = vld [vmem:[#allocation5 + $0x1a0] ss:$16 sps:$4 sm:$0xff]  }
  0x64   :  { %v2942_v41 = vld [vmem:[#allocation5 + $0x3a4] ss:$16 sps:$4 sm:$0xff]   ;;  %v2945_v43 = vld [vmem:[#allocation5 + $0x3a0] ss:$16 sps:$4 sm:$0xff]  }
  0x65   :  { %1370 = vmatpush1.bf16.msra.mxu0 %v2914_v22  ;;  %v2946_v44 = vld [vmem:[#allocation5 + $0x184] ss:$16 sps:$4 sm:$0xff]   ;;  %v2950_v46 = vld [vmem:[#allocation5 + $0x180] ss:$16 sps:$4 sm:$0xff]   ;;  %v3004_v22 = vld [vmem:[#allocation5 + $0xa8] ss:$16 sps:$4 sm:$0xff]  }
  0x66   :  { %1413 = vmatpush1.bf16.msra.mxu1 %v2915_v23  ;;  %1371 = vmatprep.subr.bf16.mxu0 %v2916_v24  ;;  %v2948_v45 = vld [vmem:[#allocation5 + $0x384] ss:$16 sps:$4 sm:$0xff]   ;;  %v2951_v47 = vld [vmem:[#allocation5 + $0x380] ss:$16 sps:$4 sm:$0xff]   ;;  %v3012_v24 = vld [vmem:[#allocation5 + $0x8c] ss:$16 sps:$4 sm:$0xff]  }
  0x67   :  { %1414 = vmatprep.subr.bf16.mxu1 %v2918_v25  ;;  %v2952_v48 = vld [vmem:[#allocation5 + $0x164] ss:$16 sps:$4 sm:$0xff]   ;;  %v2956_v52 = vld [vmem:[#allocation5 + $0x160] ss:$16 sps:$4 sm:$0xff]  }
  0x68   :  { %v2954_v50 = vld [vmem:[#allocation5 + $0x364] ss:$16 sps:$4 sm:$0xff]   ;;  %v2957_v53 = vld [vmem:[#allocation5 + $0x360] ss:$16 sps:$4 sm:$0xff]  }
  0x69   :  { %1372 = vmatpush1.bf16.msra.mxu0 %v2920_v26  ;;  %v3545_v51 = vld [vmem:[#allocation2 + $0xc] ss:$28 sps:$4 sm:$0xff]   ;;  %v3549_v4 = vld [vmem:[#allocation2] ss:$28 sps:$4 sm:$0xff]   ;;  %v3556_v14 = vld [vmem:[#allocation2 + $0x18] ss:$28 sps:$4 sm:$0xff]  }
  0x6a   :  { %1415 = vmatpush1.bf16.msra.mxu1 %v2921_v27  ;;  %1373 = vmatprep.subr.bf16.mxu0 %v2922_v28  ;;  %v2958_v54 = vld [vmem:[#allocation5 + $0x144] ss:$16 sps:$4 sm:$0xff]   ;;  %v2962_v56 = vld [vmem:[#allocation5 + $0x140] ss:$16 sps:$4 sm:$0xff]   ;;  %v3010_v26 = vld [vmem:[#allocation5 + $0x88] ss:$16 sps:$4 sm:$0xff]  }
  0x6b   :  { %1416 = vmatprep.subr.bf16.mxu1 %v2924_v29  ;;  %1434 = vmatprep.mubr.bf16.mxu1 %v3545_v51  ;;  %v2960_v55 = vld [vmem:[#allocation5 + $0x344] ss:$16 sps:$4 sm:$0xff]   ;;  %v2963_v57 = vld [vmem:[#allocation5 + $0x340] ss:$16 sps:$4 sm:$0xff]   ;;  %v3018_v28 = vld [vmem:[#allocation5 + $0x6c] ss:$16 sps:$4 sm:$0xff]  }
  0x6c   :  { %v2964_v58 = vld [vmem:[#allocation5 + $0x124] ss:$16 sps:$4 sm:$0xff]   ;;  %v2968_v60 = vld [vmem:[#allocation5 + $0x120] ss:$16 sps:$4 sm:$0xff]  }
  0x6d   :  { %1374 = vmatpush1.bf16.msra.mxu0 %v2926_v30  ;;  %v2966_v59 = vld [vmem:[#allocation5 + $0x324] ss:$16 sps:$4 sm:$0xff]   ;;  %v2969_v61 = vld [vmem:[#allocation5 + $0x320] ss:$16 sps:$4 sm:$0xff]   ;;  %v3016_v30 = vld [vmem:[#allocation5 + $0x68] ss:$16 sps:$4 sm:$0xff]  }
  0x6e   :  { %1417 = vmatpush1.bf16.msra.mxu1 %v2927_v31  ;;  %1375 = vmatprep.subr.bf16.mxu0 %v2928_v32  ;;  %v2970_v62 = vld [vmem:[#allocation5 + $0x104] ss:$16 sps:$4 sm:$0xff]   ;;  %v2974_v0 = vld [vmem:[#allocation5 + $0x100] ss:$16 sps:$4 sm:$0xff]   ;;  %v3024_v32 = vld [vmem:[#allocation5 + $0x4c] ss:$16 sps:$4 sm:$0xff]  }
  0x6f   :  { %1418 = vmatprep.subr.bf16.mxu1 %v2930_v33  ;;  %v2972_v63 = vld [vmem:[#allocation5 + $0x304] ss:$16 sps:$4 sm:$0xff]   ;;  %v2975_v1 = vld [vmem:[#allocation5 + $0x300] ss:$16 sps:$4 sm:$0xff]   ;;  %v3561_v33 = vld [vmem:[#allocation2 + $0x14] ss:$28 sps:$4 sm:$0xff]  }
  0x70   :  { %v2984_v2 = vld [vmem:[#allocation5 + $0x4e4] ss:$16 sps:$4 sm:$0xff]   ;;  %v3551_v5 = vld [vmem:[#allocation2 + $0x8] ss:$28 sps:$4 sm:$0xff]  }
  0x71   :  { %1376 = vmatpush2.bf16.msra.mxu0 %v2932_v34  ;;  %v2987_v3 = vld [vmem:[#allocation5 + $0x604] ss:$16 sps:$4 sm:$0xff]   ;;  %v2982_v6 = vld [vmem:[#allocation5 + $0x4e0] ss:$16 sps:$4 sm:$0xff]  }
  0x72   :  { %1419 = vmatpush2.bf16.msra.mxu1 %v2933_v35  ;;  %1377 = vmatprep.subr.bf16.mxu0 %v2934_v36  ;;  %v2985_v7 = vld [vmem:[#allocation5 + $0x600] ss:$16 sps:$4 sm:$0xff]   ;;  %v2990_v8 = vld [vmem:[#allocation5 + $0x4c4] ss:$16 sps:$4 sm:$0xff]   ;;  %v3022_v35 = vld [vmem:[#allocation5 + $0x48] ss:$16 sps:$4 sm:$0xff]  }
  0x73   :  { %1420 = vmatprep.subr.bf16.mxu1 %v2936_v37  ;;  %v2988_v10 = vld [vmem:[#allocation5 + $0x4c0] ss:$16 sps:$4 sm:$0xff]   ;;  %v2996_v12 = vld [vmem:[#allocation5 + $0x4a4] ss:$16 sps:$4 sm:$0xff]   ;;  %v3030_v37 = vld [vmem:[#allocation5 + $0x2c] ss:$16 sps:$4 sm:$0xff]  }
  0x74   :  { %v2994_v15 = vld [vmem:[#allocation5 + $0x4a0] ss:$16 sps:$4 sm:$0xff]   ;;  %v3003_v17 = vld [vmem:[#allocation5 + $0x484] ss:$16 sps:$4 sm:$0xff]  }
  0x75   :  { %1378 = vmatpush2.bf16.msra.mxu0 %v2938_v38  ;;  %v3001_v19 = vld [vmem:[#allocation5 + $0x480] ss:$16 sps:$4 sm:$0xff]   ;;  %v3009_v21 = vld [vmem:[#allocation5 + $0x464] ss:$16 sps:$4 sm:$0xff]  }
  0x76   :  { %1421 = vmatpush2.bf16.msra.mxu1 %v2939_v39  ;;  %1379 = vmatprep.subr.bf16.mxu0 %v2940_v40  ;;  %v3007_v23 = vld [vmem:[#allocation5 + $0x460] ss:$16 sps:$4 sm:$0xff]   ;;  %v3015_v25 = vld [vmem:[#allocation5 + $0x444] ss:$16 sps:$4 sm:$0xff]   ;;  %v3028_v39 = vld [vmem:[#allocation5 + $0x28] ss:$16 sps:$4 sm:$0xff]  }
  0x77   :  { %1422 = vmatprep.subr.bf16.mxu1 %v2942_v41  ;;  %v3013_v27 = vld [vmem:[#allocation5 + $0x440] ss:$16 sps:$4 sm:$0xff]   ;;  %v3021_v29 = vld [vmem:[#allocation5 + $0x424] ss:$16 sps:$4 sm:$0xff]   ;;  %v3036_v41 = vld [vmem:[#allocation5 + $0xc] ss:$16 sps:$4 sm:$0xff]  }
  0x78   :  { %v3019_v31 = vld [vmem:[#allocation5 + $0x420] ss:$16 sps:$4 sm:$0xff]   ;;  %v3027_v34 = vld [vmem:[#allocation5 + $0x404] ss:$16 sps:$4 sm:$0xff]  }
  0x79   :  { %1380 = vmatpush2.bf16.msra.mxu0 %v2944_v42  ;;  %v3025_v36 = vld [vmem:[#allocation5 + $0x400] ss:$16 sps:$4 sm:$0xff]   ;;  %v3033_v38 = vld [vmem:[#allocation5 + $0x5e4] ss:$16 sps:$4 sm:$0xff]  }
  0x7a   :  { %1423 = vmatpush2.bf16.msra.mxu1 %v2945_v43  ;;  %1381 = vmatprep.subr.bf16.mxu0 %v2946_v44  ;;  %v3031_v40 = vld [vmem:[#allocation5 + $0x5e0] ss:$16 sps:$4 sm:$0xff]   ;;  %v3039_v42 = vld [vmem:[#allocation5 + $0x5c4] ss:$16 sps:$4 sm:$0xff]   ;;  %v3034_v43 = vld [vmem:[#allocation5 + $0x8] ss:$16 sps:$4 sm:$0xff]  }
  0x7b   :  { %1424 = vmatprep.subr.bf16.mxu1 %v2948_v45  ;;  %v3037_v44 = vld [vmem:[#allocation5 + $0x5c0] ss:$16 sps:$4 sm:$0xff]   ;;  %v3042_v45 = vld [vmem:[#allocation5 + $0x1ec] ss:$16 sps:$4 sm:$0xff]  }
  0x7d   :  { %1382 = vmatpush2.bf16.msra.mxu0 %v2950_v46  ;;  %v3045_v46 = vld [vmem:[#allocation5 + $0x5a4] ss:$16 sps:$4 sm:$0xff]  }
  0x7e   :  { %1425 = vmatpush2.bf16.msra.mxu1 %v2951_v47  ;;  %1383 = vmatprep.subr.bf16.mxu0 %v2952_v48  ;;  %v3040_v47 = vld [vmem:[#allocation5 + $0x1e8] ss:$16 sps:$4 sm:$0xff]   ;;  %v3043_v48 = vld [vmem:[#allocation5 + $0x5a0] ss:$16 sps:$4 sm:$0xff]  }
  0x7f   :  { %1426 = vmatprep.subr.bf16.mxu1 %v2954_v50  ;;  %v3051_v50 = vld [vmem:[#allocation5 + $0x584] ss:$16 sps:$4 sm:$0xff]  }
  0x81   :  { %1384 = vmatpush2.bf16.msra.mxu0 %v2956_v52  ;;  %v3046_v52 = vld [vmem:[#allocation5 + $0x1c8] ss:$16 sps:$4 sm:$0xff]  }
  0x82   :  { %1427 = vmatpush2.bf16.msra.mxu1 %v2957_v53  ;;  %1385 = vmatprep.subr.bf16.mxu0 %v2958_v54  ;;  %v3049_v53 = vld [vmem:[#allocation5 + $0x580] ss:$16 sps:$4 sm:$0xff]   ;;  %v3054_v54 = vld [vmem:[#allocation5 + $0x1ac] ss:$16 sps:$4 sm:$0xff]  }
  0x83   :  { %1428 = vmatprep.subr.bf16.mxu1 %v2960_v55  ;;  %v3057_v55 = vld [vmem:[#allocation5 + $0x564] ss:$16 sps:$4 sm:$0xff]  }
  0x85   :  { %1386 = vmatpush2.bf16.msra.mxu0 %v2962_v56  ;;  %v3052_v56 = vld [vmem:[#allocation5 + $0x1a8] ss:$16 sps:$4 sm:$0xff]  }
  0x86   :  { %1429 = vmatpush2.bf16.msra.mxu1 %v2963_v57  ;;  %1387 = vmatprep.subr.bf16.mxu0 %v2964_v58  ;;  %v3055_v57 = vld [vmem:[#allocation5 + $0x560] ss:$16 sps:$4 sm:$0xff]   ;;  %v3060_v58 = vld [vmem:[#allocation5 + $0x18c] ss:$16 sps:$4 sm:$0xff]  }
  0x87   :  { %1430 = vmatprep.subr.bf16.mxu1 %v2966_v59  ;;  %v3063_v59 = vld [vmem:[#allocation5 + $0x544] ss:$16 sps:$4 sm:$0xff]  }
  0x89   :  { %1388 = vmatpush2.bf16.msra.mxu0 %v2968_v60  ;;  %v3058_v60 = vld [vmem:[#allocation5 + $0x188] ss:$16 sps:$4 sm:$0xff]  }
  0x8a   :  { %1431 = vmatpush2.bf16.msra.mxu1 %v2969_v61  ;;  %1389 = vmatprep.subr.bf16.mxu0 %v2970_v62  ;;  %v3061_v61 = vld [vmem:[#allocation5 + $0x540] ss:$16 sps:$4 sm:$0xff]   ;;  %v3066_v62 = vld [vmem:[#allocation5 + $0x16c] ss:$16 sps:$4 sm:$0xff]  }
  0x8b   :  { %1432 = vmatprep.subr.bf16.mxu1 %v2972_v63  ;;  %v3069_v63 = vld [vmem:[#allocation5 + $0x524] ss:$16 sps:$4 sm:$0xff]  }
  0x8d   :  { %1390 = vmatpush2.bf16.msra.mxu0 %v2974_v0  ;;  %v3064_v0 = vld [vmem:[#allocation5 + $0x168] ss:$16 sps:$4 sm:$0xff]  }
  0x8e   :  { %1433 = vmatpush2.bf16.msra.mxu1 %v2975_v1  ;;  %1445 = vmatprep.subr.bf16.mxu0 %v2984_v2  ;;  %v3067_v1 = vld [vmem:[#allocation5 + $0x520] ss:$16 sps:$4 sm:$0xff]   ;;  %v3072_v2 = vld [vmem:[#allocation5 + $0x14c] ss:$16 sps:$4 sm:$0xff]  }
  0x8f   :  { %1502 = vmatprep.subr.bf16.mxu1 %v2987_v3  ;;  %v3075_v3 = vld [vmem:[#allocation5 + $0x504] ss:$16 sps:$4 sm:$0xff]  }
  0x90   :  { %1392 = vmatmul.mubr.bf16.vlgmr.msra.gmra.mxu0 %v3549_v4 }
  0x91   :  { %1435 = vmatmul.mubr.bf16.vlgmr.msra.gmra.mxu1 %v3551_v5  ;;  %1446 = vmatpush1.bf16.msra.mxu0 %v2982_v6  ;;  %v3070_v6 = vld [vmem:[#allocation5 + $0x148] ss:$16 sps:$4 sm:$0xff]  }
  0x92   :  { %1503 = vmatpush1.bf16.msra.mxu1 %v2985_v7  ;;  %1447 = vmatprep.subr.bf16.mxu0 %v2990_v8  ;;  %v3073_v7 = vld [vmem:[#allocation5 + $0x500] ss:$16 sps:$4 sm:$0xff]   ;;  %v3081_v8 = vld [vmem:[#allocation5 + $0x12c] ss:$16 sps:$4 sm:$0xff]  }
  0x93   :  { %1520 = vmatprep.mubr.bf16.mxu1 %v3468_v11  ;;  %1531 = vmatprep.subr.bf16.mxu1 %v2993_v9  ;;  %v3084_v9 = vld [vmem:[#allocation5 + $0x2ec] ss:$16 sps:$4 sm:$0xff]  }
  0x94   :  { %1477 = vmatprep.mubr.bf16.mxu0 %v3561_v33 }
  0x95   :  { %1448 = vmatpush1.bf16.msra.mxu0 %v2988_v10  ;;  %v3564_v10 = vld [vmem:[#allocation2 + $0x10] ss:$28 sps:$4 sm:$0xff]  }
  0x96   :  { %1449 = vmatprep.subr.bf16.mxu0 %v2996_v12  ;;  %v3079_v12 = vld [vmem:[#allocation5 + $0x128] ss:$16 sps:$4 sm:$0xff]  }
  0x99   :  { %2719 = vmatmul.mubr.msk.bf16.vlgmr.msra.gmra.mxu1 %vm1355_vm0, %v3556_v14  ;;  %1450 = vmatpush1.bf16.msra.mxu0 %v2994_v15  ;;  %v3087_v15 = vld [vmem:[#allocation5 + $0x10c] ss:$16 sps:$4 sm:$0xff]  }
  0x9a   :  { %1532 = vmatpush1.bf16.msra.mxu1 %v2991_v13  ;;  %1451 = vmatprep.subr.bf16.mxu0 %v3003_v17  ;;  %v3082_v13 = vld [vmem:[#allocation5 + $0x2e8] ss:$16 sps:$4 sm:$0xff]  }
  0x9b   :  { %1533 = vmatprep.subr.bf16.mxu1 %v3000_v16  ;;  %1563 = vmatprep.mubr.bf16.mxu1 %v3543_v49  ;;  %v3048_v49 = vld [vmem:[#allocation5 + $0x1cc] ss:$16 sps:$4 sm:$0xff]   ;;  %v3085_v17 = vld [vmem:[#allocation5 + $0x108] ss:$16 sps:$4 sm:$0xff]  }
  0x9c   :  { %v3090_v16 = vld [vmem:[#allocation5 + $0x2cc] ss:$16 sps:$4 sm:$0xff]  }
  0x9d   :  { %1452 = vmatpush1.bf16.msra.mxu0 %v3001_v19  ;;  %v3093_v19 = vld [vmem:[#allocation5 + $0x4ec] ss:$16 sps:$4 sm:$0xff]  }
  0x9e   :  { %1534 = vmatpush1.bf16.msra.mxu1 %v2998_v18  ;;  %1453 = vmatprep.subr.bf16.mxu0 %v3009_v21  ;;  %v3088_v18 = vld [vmem:[#allocation5 + $0x2c8] ss:$16 sps:$4 sm:$0xff]  }
  0x9f   :  { %1535 = vmatprep.subr.bf16.mxu1 %v3006_v20  ;;  %v3096_v20 = vld [vmem:[#allocation5 + $0x2ac] ss:$16 sps:$4 sm:$0xff]   ;;  %v3091_v21 = vld [vmem:[#allocation5 + $0x4e8] ss:$16 sps:$4 sm:$0xff]  }
  0xa1   :  { %1454 = vmatpush1.bf16.msra.mxu0 %v3007_v23  ;;  %v3099_v23 = vld [vmem:[#allocation5 + $0x4cc] ss:$16 sps:$4 sm:$0xff]  }
  0xa2   :  { %1536 = vmatpush1.bf16.msra.mxu1 %v3004_v22  ;;  %1455 = vmatprep.subr.bf16.mxu0 %v3015_v25  ;;  %v3094_v22 = vld [vmem:[#allocation5 + $0x2a8] ss:$16 sps:$4 sm:$0xff]  }
  0xa3   :  { %1537 = vmatprep.subr.bf16.mxu1 %v3012_v24  ;;  %v3102_v24 = vld [vmem:[#allocation5 + $0x28c] ss:$16 sps:$4 sm:$0xff]   ;;  %v3097_v25 = vld [vmem:[#allocation5 + $0x4c8] ss:$16 sps:$4 sm:$0xff]  }
  0xa5   :  { %1456 = vmatpush1.bf16.msra.mxu0 %v3013_v27  ;;  %v3105_v27 = vld [vmem:[#allocation5 + $0x4ac] ss:$16 sps:$4 sm:$0xff]  }
  0xa6   :  { %1538 = vmatpush1.bf16.msra.mxu1 %v3010_v26  ;;  %1457 = vmatprep.subr.bf16.mxu0 %v3021_v29  ;;  %v3100_v26 = vld [vmem:[#allocation5 + $0x288] ss:$16 sps:$4 sm:$0xff]  }
  0xa7   :  { %1539 = vmatprep.subr.bf16.mxu1 %v3018_v28  ;;  %v3108_v28 = vld [vmem:[#allocation5 + $0x26c] ss:$16 sps:$4 sm:$0xff]   ;;  %v3103_v29 = vld [vmem:[#allocation5 + $0x4a8] ss:$16 sps:$4 sm:$0xff]  }
  0xa9   :  { %1458 = vmatpush1.bf16.msra.mxu0 %v3019_v31  ;;  %v3114_v31 = vld [vmem:[#allocation5 + $0x24c] ss:$16 sps:$4 sm:$0xff]  }
  0xaa   :  { %1540 = vmatpush1.bf16.msra.mxu1 %v3016_v30  ;;  %1459 = vmatprep.subr.bf16.mxu0 %v3027_v34  ;;  %v3106_v30 = vld [vmem:[#allocation5 + $0x268] ss:$16 sps:$4 sm:$0xff]   ;;  %v3117_v34 = vld [vmem:[#allocation5 + $0x46c] ss:$16 sps:$4 sm:$0xff]  }
  0xab   :  { %1541 = vmatprep.subr.bf16.mxu1 %v3024_v32  ;;  %v3109_v32 = vld [vmem:[#allocation5 + $0x488] ss:$16 sps:$4 sm:$0xff]  }
  0xad   :  { %1460 = vmatpush1.bf16.msra.mxu0 %v3025_v36  ;;  %v3115_v36 = vld [vmem:[#allocation5 + $0x468] ss:$16 sps:$4 sm:$0xff]  }
  0xae   :  { %1542 = vmatpush1.bf16.msra.mxu1 %v3022_v35  ;;  %1461 = vmatprep.subr.bf16.mxu0 %v3033_v38  ;;  %v3120_v35 = vld [vmem:[#allocation5 + $0x22c] ss:$16 sps:$4 sm:$0xff]  }
  0xaf   :  { %1543 = vmatprep.subr.bf16.mxu1 %v3030_v37  ;;  %v3118_v37 = vld [vmem:[#allocation5 + $0x228] ss:$16 sps:$4 sm:$0xff]   ;;  %v3123_v38 = vld [vmem:[#allocation5 + $0x44c] ss:$16 sps:$4 sm:$0xff]  }
  0xb1   :  { %1462 = vmatpush2.bf16.msra.mxu0 %v3031_v40  ;;  %v3124_v40 = vld [vmem:[#allocation5 + $0x208] ss:$16 sps:$4 sm:$0xff]  }
  0xb2   :  { %1544 = vmatpush1.bf16.msra.mxu1 %v3028_v39  ;;  %1463 = vmatprep.subr.bf16.mxu0 %v3039_v42  ;;  %v3121_v39 = vld [vmem:[#allocation5 + $0x448] ss:$16 sps:$4 sm:$0xff]   ;;  %v3132_v42 = vld [vmem:[#allocation5 + $0x3ec] ss:$16 sps:$4 sm:$0xff]  }
  0xb3   :  { %1545 = vmatprep.subr.bf16.mxu1 %v3036_v41  ;;  %v3129_v41 = vld [vmem:[#allocation5 + $0x42c] ss:$16 sps:$4 sm:$0xff]  }
  0xb5   :  { %1464 = vmatpush2.bf16.msra.mxu0 %v3037_v44  ;;  %v3130_v44 = vld [vmem:[#allocation5 + $0x3e8] ss:$16 sps:$4 sm:$0xff]  }
  0xb6   :  { %1546 = vmatpush1.bf16.msra.mxu1 %v3034_v43  ;;  %1465 = vmatprep.subr.bf16.mxu0 %v3045_v46  ;;  %v3127_v43 = vld [vmem:[#allocation5 + $0x428] ss:$16 sps:$4 sm:$0xff]   ;;  %v3138_v46 = vld [vmem:[#allocation5 + $0x3cc] ss:$16 sps:$4 sm:$0xff]  }
  0xb7   :  { %1547 = vmatprep.subr.bf16.mxu1 %v3042_v45  ;;  %v3135_v45 = vld [vmem:[#allocation5 + $0x40c] ss:$16 sps:$4 sm:$0xff]  }
  0xb9   :  { %1466 = vmatpush2.bf16.msra.mxu0 %v3043_v48  ;;  %v3136_v48 = vld [vmem:[#allocation5 + $0x3c8] ss:$16 sps:$4 sm:$0xff]  }
  0xba   :  { %1548 = vmatpush2.bf16.msra.mxu1 %v3040_v47  ;;  %1467 = vmatprep.subr.bf16.mxu0 %v3051_v50  ;;  %v3133_v47 = vld [vmem:[#allocation5 + $0x408] ss:$16 sps:$4 sm:$0xff]   ;;  %v3144_v50 = vld [vmem:[#allocation5 + $0x3ac] ss:$16 sps:$4 sm:$0xff]  }
  0xbb   :  { %1549 = vmatprep.subr.bf16.mxu1 %v3048_v49  ;;  %v3141_v49 = vld [vmem:[#allocation5 + $0x5ec] ss:$16 sps:$4 sm:$0xff]  }
  0xbd   :  { %1468 = vmatpush2.bf16.msra.mxu0 %v3049_v53  ;;  %v3142_v53 = vld [vmem:[#allocation5 + $0x3a8] ss:$16 sps:$4 sm:$0xff]  }
  0xbe   :  { %1550 = vmatpush2.bf16.msra.mxu1 %v3046_v52  ;;  %1469 = vmatprep.subr.bf16.mxu0 %v3057_v55  ;;  %v3139_v52 = vld [vmem:[#allocation5 + $0x5e8] ss:$16 sps:$4 sm:$0xff]   ;;  %v3150_v55 = vld [vmem:[#allocation5 + $0x38c] ss:$16 sps:$4 sm:$0xff]  }
  0xbf   :  { %1551 = vmatprep.subr.bf16.mxu1 %v3054_v54  ;;  %v3147_v54 = vld [vmem:[#allocation5 + $0x5cc] ss:$16 sps:$4 sm:$0xff]  }
  0xc1   :  { %1470 = vmatpush2.bf16.msra.mxu0 %v3055_v57  ;;  %v3148_v57 = vld [vmem:[#allocation5 + $0x388] ss:$16 sps:$4 sm:$0xff]  }
  0xc2   :  { %1552 = vmatpush2.bf16.msra.mxu1 %v3052_v56  ;;  %1471 = vmatprep.subr.bf16.mxu0 %v3063_v59  ;;  %v3145_v56 = vld [vmem:[#allocation5 + $0x5c8] ss:$16 sps:$4 sm:$0xff]   ;;  %v3156_v59 = vld [vmem:[#allocation5 + $0x36c] ss:$16 sps:$4 sm:$0xff]  }
  0xc3   :  { %1553 = vmatprep.subr.bf16.mxu1 %v3060_v58  ;;  %v3153_v58 = vld [vmem:[#allocation5 + $0x5ac] ss:$16 sps:$4 sm:$0xff]  }
  0xc5   :  { %1472 = vmatpush2.bf16.msra.mxu0 %v3061_v61  ;;  %v3154_v61 = vld [vmem:[#allocation5 + $0x368] ss:$16 sps:$4 sm:$0xff]  }
  0xc6   :  { %1554 = vmatpush2.bf16.msra.mxu1 %v3058_v60  ;;  %1473 = vmatprep.subr.bf16.mxu0 %v3069_v63  ;;  %v3151_v60 = vld [vmem:[#allocation5 + $0x5a8] ss:$16 sps:$4 sm:$0xff]   ;;  %v3162_v63 = vld [vmem:[#allocation5 + $0x34c] ss:$16 sps:$4 sm:$0xff]  }
  0xc7   :  { %1555 = vmatprep.subr.bf16.mxu1 %v3066_v62  ;;  %v3159_v62 = vld [vmem:[#allocation5 + $0x58c] ss:$16 sps:$4 sm:$0xff]  }
  0xc9   :  { %1474 = vmatpush2.bf16.msra.mxu0 %v3067_v1  ;;  %v3160_v1 = vld [vmem:[#allocation5 + $0x348] ss:$16 sps:$4 sm:$0xff]  }
  0xca   :  { %1556 = vmatpush2.bf16.msra.mxu1 %v3064_v0  ;;  %1475 = vmatprep.subr.bf16.mxu0 %v3075_v3  ;;  %v3157_v0 = vld [vmem:[#allocation5 + $0x588] ss:$16 sps:$4 sm:$0xff]   ;;  %v3168_v3 = vld [vmem:[#allocation5 + $0x32c] ss:$16 sps:$4 sm:$0xff]  }
  0xcb   :  { %1557 = vmatprep.subr.bf16.mxu1 %v3072_v2  ;;  %v3165_v2 = vld [vmem:[#allocation5 + $0x56c] ss:$16 sps:$4 sm:$0xff]  }
  0xcd   :  { %1476 = vmatpush2.bf16.msra.mxu0 %v3073_v7  ;;  %v3166_v7 = vld [vmem:[#allocation5 + $0x328] ss:$16 sps:$4 sm:$0xff]  }
  0xce   :  { %1558 = vmatpush2.bf16.msra.mxu1 %v3070_v6  ;;  %1574 = vmatprep.subr.bf16.mxu0 %v3084_v9  ;;  %v3163_v6 = vld [vmem:[#allocation5 + $0x568] ss:$16 sps:$4 sm:$0xff]   ;;  %v3174_v9 = vld [vmem:[#allocation5 + $0x30c] ss:$16 sps:$4 sm:$0xff]  }
  0xcf   :  { %1559 = vmatprep.subr.bf16.mxu1 %v3081_v8  ;;  %v3171_v8 = vld [vmem:[#allocation5 + $0x54c] ss:$16 sps:$4 sm:$0xff]  }
  0xd0   :  { %1478 = vmatmul.mubr.bf16.vlgmr.msra.gmra.mxu0 %v3564_v10 }
  0xd1   :  { %1575 = vmatpush1.bf16.msra.mxu0 %v3082_v13  ;;  %1606 = vmatprep.mubr.bf16.mxu0 %v3545_v51  ;;  %v3111_v51 = vld [vmem:[#allocation5 + $0x48c] ss:$16 sps:$4 sm:$0xff]   ;;  %v3172_v13 = vld [vmem:[#allocation5 + $0x308] ss:$16 sps:$4 sm:$0xff]  }
  0xd2   :  { %1560 = vmatpush2.bf16.msra.mxu1 %v3079_v12  ;;  %1576 = vmatprep.subr.bf16.mxu0 %v3090_v16  ;;  %v3169_v12 = vld [vmem:[#allocation5 + $0x548] ss:$16 sps:$4 sm:$0xff]   ;;  %v3180_v16 = vld [vmem:[#allocation5 + $0x60c] ss:$16 sps:$4 sm:$0xff]  }
  0xd3   :  { %1561 = vmatprep.subr.bf16.mxu1 %v3087_v15  ;;  %v3177_v15 = vld [vmem:[#allocation5 + $0x52c] ss:$16 sps:$4 sm:$0xff]  }
  0xd5   :  { %1577 = vmatpush1.bf16.msra.mxu0 %v3088_v18  ;;  %v3178_v18 = vld [vmem:[#allocation5 + $0x608] ss:$16 sps:$4 sm:$0xff]  }
  0xd6   :  { %1562 = vmatpush2.bf16.msra.mxu1 %v3085_v17  ;;  %1578 = vmatprep.subr.bf16.mxu0 %v3096_v20  ;;  %v3175_v17 = vld [vmem:[#allocation5 + $0x528] ss:$16 sps:$4 sm:$0xff]  }
  0xd7   :  { %1617 = vmatprep.subr.bf16.mxu1 %v3093_v19  ;;  %v3183_v19 = vld [vmem:[#allocation5 + $0x50c] ss:$16 sps:$4 sm:$0xff]   ;;  %v3186_v20 = vld [vmem:[#allocation8 + $0x74] ss:$8 sps:$4 sm:$0xff]  }
  0xd9   :  { %1564 = vmatmul.mubr.bf16.vlgmr.msra.gmra.mxu1 %v3549_v4  ;;  %1579 = vmatpush1.bf16.msra.mxu0 %v3094_v22  ;;  %v3112_v4 = vld [vmem:[#allocation5 + $0x248] ss:$16 sps:$4 sm:$0xff]   ;;  %v3184_v22 = vld [vmem:[#allocation8 + $0x70] ss:$8 sps:$4 sm:$0xff]  }
  0xda   :  { %1618 = vmatpush1.bf16.msra.mxu1 %v3091_v21  ;;  %1580 = vmatprep.subr.bf16.mxu0 %v3102_v24  ;;  %v3181_v21 = vld [vmem:[#allocation5 + $0x508] ss:$16 sps:$4 sm:$0xff]   ;;  %v3187_v24 = vld [vmem:[#allocation8 + $0x60] ss:$8 sps:$4 sm:$0xff]  }
  0xdb   :  { %1619 = vmatprep.subr.bf16.mxu1 %v3099_v23  ;;  %1649 = vmatprep.mubr.bf16.mxu1 %v3561_v33  ;;  %v3126_v33 = vld [vmem:[#allocation5 + $0x20c] ss:$16 sps:$4 sm:$0xff]   ;;  %v3189_v23 = vld [vmem:[#allocation8 + $0x64] ss:$8 sps:$4 sm:$0xff]  }
  0xdd   :  { %1581 = vmatpush1.bf16.msra.mxu0 %v3100_v26  ;;  %v3195_v26 = vld [vmem:[#allocation8 + $0x44] ss:$8 sps:$4 sm:$0xff]  }
  0xde   :  { %1620 = vmatpush1.bf16.msra.mxu1 %v3097_v25  ;;  %1582 = vmatprep.subr.bf16.mxu0 %v3108_v28  ;;  %v3192_v25 = vld [vmem:[#allocation8 + $0x54] ss:$8 sps:$4 sm:$0xff]  }
  0xdf   :  { %1621 = vmatprep.subr.bf16.mxu1 %v3105_v27  ;;  %v3232_v27 = vld [vmem:[#allocation8 + $0x170] ss:$8 sps:$4 sm:$0xff]   ;;  %v3234_v28 = vld [vmem:[#allocation8 + $0x174] ss:$8 sps:$4 sm:$0xff]  }
  0xe1   :  { %1583 = vmatpush1.bf16.msra.mxu0 %v3106_v30  ;;  %v3198_v30 = vld [vmem:[#allocation8 + $0x34] ss:$8 sps:$4 sm:$0xff]  }
  0xe2   :  { %1622 = vmatpush1.bf16.msra.mxu1 %v3103_v29  ;;  %1584 = vmatprep.subr.bf16.mxu0 %v3114_v31  ;;  %v3237_v29 = vld [vmem:[#allocation8 + $0x164] ss:$8 sps:$4 sm:$0xff]  }
  0xe3   :  { %1623 = vmatprep.subr.bf16.mxu1 %v3111_v51  ;;  %v3196_v51 = vld [vmem:[#allocation8 + $0x30] ss:$8 sps:$4 sm:$0xff]   ;;  %v3201_v31 = vld [vmem:[#allocation8 + $0x24] ss:$8 sps:$4 sm:$0xff]  }
  0xe5   :  { %1585 = vmatpush1.bf16.msra.mxu0 %v3112_v4  ;;  %v3243_v4 = vld [vmem:[#allocation8 + $0x144] ss:$8 sps:$4 sm:$0xff]  }
  0xe6   :  { %1624 = vmatpush1.bf16.msra.mxu1 %v3109_v32  ;;  %1586 = vmatprep.subr.bf16.mxu0 %v3120_v35  ;;  %v3238_v32 = vld [vmem:[#allocation8 + $0x150] ss:$8 sps:$4 sm:$0xff]   ;;  %v3204_v35 = vld [vmem:[#allocation8 + $0x14] ss:$8 sps:$4 sm:$0xff]  }
  0xe7   :  { %1625 = vmatprep.subr.bf16.mxu1 %v3117_v34  ;;  %v3199_v34 = vld [vmem:[#allocation8 + $0x20] ss:$8 sps:$4 sm:$0xff]  }
  0xe9   :  { %1587 = vmatpush1.bf16.msra.mxu0 %v3118_v37  ;;  %v3246_v37 = vld [vmem:[#allocation8 + $0x134] ss:$8 sps:$4 sm:$0xff]  }
  0xea   :  { %1626 = vmatpush1.bf16.msra.mxu1 %v3115_v36  ;;  %1588 = vmatprep.subr.bf16.mxu0 %v3126_v33  ;;  %v3241_v36 = vld [vmem:[#allocation8 + $0x140] ss:$8 sps:$4 sm:$0xff]   ;;  %v3207_v33 = vld [vmem:[#allocation8 + $0x4] ss:$8 sps:$4 sm:$0xff]  }
  0xeb   :  { %1627 = vmatprep.subr.bf16.mxu1 %v3123_v38  ;;  %v3202_v38 = vld [vmem:[#allocation8 + $0x10] ss:$8 sps:$4 sm:$0xff]  }
  0xed   :  { %1589 = vmatpush1.bf16.msra.mxu0 %v3124_v40  ;;  %v3249_v40 = vld [vmem:[#allocation8 + $0x124] ss:$8 sps:$4 sm:$0xff]  }
  0xee   :  { %1628 = vmatpush1.bf16.msra.mxu1 %v3121_v39  ;;  %1590 = vmatprep.subr.bf16.mxu0 %v3132_v42  ;;  %v3244_v39 = vld [vmem:[#allocation8 + $0x130] ss:$8 sps:$4 sm:$0xff]   ;;  %v3210_v42 = vld [vmem:[#allocation8 + $0xf4] ss:$8 sps:$4 sm:$0xff]  }
  0xef   :  { %1629 = vmatprep.subr.bf16.mxu1 %v3129_v41  ;;  %v3205_v41 = vld [vmem:[#allocation8] ss:$8 sps:$4 sm:$0xff]  }
  0xf1   :  { %1591 = vmatpush2.bf16.msra.mxu0 %v3130_v44  ;;  %v3252_v44 = vld [vmem:[#allocation8 + $0x114] ss:$8 sps:$4 sm:$0xff]  }
  0xf2   :  { %1630 = vmatpush1.bf16.msra.mxu1 %v3127_v43  ;;  %1592 = vmatprep.subr.bf16.mxu0 %v3138_v46  ;;  %v3247_v43 = vld [vmem:[#allocation8 + $0x120] ss:$8 sps:$4 sm:$0xff]   ;;  %v3213_v46 = vld [vmem:[#allocation8 + $0xe4] ss:$8 sps:$4 sm:$0xff]  }
  0xf3   :  { %1631 = vmatprep.subr.bf16.mxu1 %v3135_v45  ;;  %v3208_v45 = vld [vmem:[#allocation8 + $0xf0] ss:$8 sps:$4 sm:$0xff]  }
  0xf5   :  { %1593 = vmatpush2.bf16.msra.mxu0 %v3136_v48  ;;  %v3255_v48 = vld [vmem:[#allocation8 + $0x104] ss:$8 sps:$4 sm:$0xff]  }
  0xf6   :  { %1632 = vmatpush1.bf16.msra.mxu1 %v3133_v47  ;;  %1594 = vmatprep.subr.bf16.mxu0 %v3144_v50  ;;  %v3250_v47 = vld [vmem:[#allocation8 + $0x110] ss:$8 sps:$4 sm:$0xff]   ;;  %v3216_v50 = vld [vmem:[#allocation8 + $0xd4] ss:$8 sps:$4 sm:$0xff]  }
  0xf7   :  { %1633 = vmatprep.subr.bf16.mxu1 %v3141_v49  ;;  %v3211_v49 = vld [vmem:[#allocation8 + $0xe0] ss:$8 sps:$4 sm:$0xff]  }
  0xf9   :  { %1595 = vmatpush2.bf16.msra.mxu0 %v3142_v53  ;;  %v3258_v53 = vld [vmem:[#allocation8 + $0x1f4] ss:$8 sps:$4 sm:$0xff]  }
  0xfa   :  { %1634 = vmatpush2.bf16.msra.mxu1 %v3139_v52  ;;  %1596 = vmatprep.subr.bf16.mxu0 %v3150_v55  ;;  %v3253_v52 = vld [vmem:[#allocation8 + $0x100] ss:$8 sps:$4 sm:$0xff]   ;;  %v3219_v55 = vld [vmem:[#allocation8 + $0xc4] ss:$8 sps:$4 sm:$0xff]  }
  0xfb   :  { %1635 = vmatprep.subr.bf16.mxu1 %v3147_v54  ;;  %v3214_v54 = vld [vmem:[#allocation8 + $0xd0] ss:$8 sps:$4 sm:$0xff]  }
  0xfd   :  { %1597 = vmatpush2.bf16.msra.mxu0 %v3148_v57  ;;  %v3261_v57 = vld [vmem:[#allocation8 + $0x1e4] ss:$8 sps:$4 sm:$0xff]  }
  0xfe   :  { %1636 = vmatpush2.bf16.msra.mxu1 %v3145_v56  ;;  %1598 = vmatprep.subr.bf16.mxu0 %v3156_v59  ;;  %v3256_v56 = vld [vmem:[#allocation8 + $0x1f0] ss:$8 sps:$4 sm:$0xff]   ;;  %v3222_v59 = vld [vmem:[#allocation8 + $0xb4] ss:$8 sps:$4 sm:$0xff]  }
  0xff   :  { %1637 = vmatprep.subr.bf16.mxu1 %v3153_v58  ;;  %v3217_v58 = vld [vmem:[#allocation8 + $0xc0] ss:$8 sps:$4 sm:$0xff]  }
 0x101   :  { %1599 = vmatpush2.bf16.msra.mxu0 %v3154_v61  ;;  %v3264_v61 = vld [vmem:[#allocation8 + $0x1d4] ss:$8 sps:$4 sm:$0xff]  }
 0x102   :  { %1638 = vmatpush2.bf16.msra.mxu1 %v3151_v60  ;;  %1600 = vmatprep.subr.bf16.mxu0 %v3162_v63  ;;  %v3259_v60 = vld [vmem:[#allocation8 + $0x1e0] ss:$8 sps:$4 sm:$0xff]   ;;  %v3225_v63 = vld [vmem:[#allocation8 + $0xa4] ss:$8 sps:$4 sm:$0xff]  }
 0x103   :  { %1639 = vmatprep.subr.bf16.mxu1 %v3159_v62  ;;  %v3220_v62 = vld [vmem:[#allocation8 + $0xb0] ss:$8 sps:$4 sm:$0xff]  }
 0x105   :  { %1601 = vmatpush2.bf16.msra.mxu0 %v3160_v1  ;;  %v3223_v1 = vld [vmem:[#allocation8 + $0xa0] ss:$8 sps:$4 sm:$0xff]  }
 0x106   :  { %1640 = vmatpush2.bf16.msra.mxu1 %v3157_v0  ;;  %1602 = vmatprep.subr.bf16.mxu0 %v3168_v3  ;;  %v3262_v0 = vld [vmem:[#allocation8 + $0x1d0] ss:$8 sps:$4 sm:$0xff]  }
 0x107   :  { %1641 = vmatprep.subr.bf16.mxu1 %v3165_v2  ;;  %v3228_v2 = vld [vmem:[#allocation8 + $0x94] ss:$8 sps:$4 sm:$0xff]   ;;  %v3226_v3 = vld [vmem:[#allocation8 + $0x90] ss:$8 sps:$4 sm:$0xff]  }
 0x109   :  { %1603 = vmatpush2.bf16.msra.mxu0 %v3166_v7  ;;  %v3229_v7 = vld [vmem:[#allocation8 + $0x80] ss:$8 sps:$4 sm:$0xff]  }
 0x10a   :  { %1642 = vmatpush2.bf16.msra.mxu1 %v3163_v6  ;;  %1604 = vmatprep.subr.bf16.mxu0 %v3174_v9  ;;  %v3231_v6 = vld [vmem:[#allocation8 + $0x84] ss:$8 sps:$4 sm:$0xff]   ;;  %v3265_v9 = vld [vmem:[#allocation8 + $0x1c0] ss:$8 sps:$4 sm:$0xff]  }
 0x10b   :  { %1643 = vmatprep.subr.bf16.mxu1 %v3171_v8  ;;  %v3267_v8 = vld [vmem:[#allocation8 + $0x1c4] ss:$8 sps:$4 sm:$0xff]  }
 0x10d   :  { %1605 = vmatpush2.bf16.msra.mxu0 %v3172_v13  ;;  %v3268_v13 = vld [vmem:[#allocation8 + $0x1b0] ss:$8 sps:$4 sm:$0xff]  }
 0x10e   :  { %1644 = vmatpush2.bf16.msra.mxu1 %v3169_v12  ;;  %1674 = vmatprep.subr.bf16.mxu0 %v3180_v16  ;;  %v3270_v12 = vld [vmem:[#allocation8 + $0x1b4] ss:$8 sps:$4 sm:$0xff]   ;;  %v3271_v16 = vld [vmem:[#allocation8 + $0x1a0] ss:$8 sps:$4 sm:$0xff]  }
 0x10f   :  { %1645 = vmatprep.subr.bf16.mxu1 %v3177_v15  ;;  %v3273_v15 = vld [vmem:[#allocation8 + $0x1a4] ss:$8 sps:$4 sm:$0xff]  }
 0x110   :  { %1607 = vmatmul.mubr.bf16.vlgmr.msra.gmra.mxu0 %v3551_v5  ;;  %v3190_v5 = vld [vmem:[#allocation8 + $0x50] ss:$8 sps:$4 sm:$0xff]  }
 0x111   :  { %1675 = vmatpush1.bf16.msra.mxu0 %v3178_v18  ;;  %1692 = vmatprep.mubr.bf16.mxu0 %v3468_v11  ;;  %v3193_v11 = vld [vmem:[#allocation8 + $0x40] ss:$8 sps:$4 sm:$0xff]   ;;  %v3274_v18 = vld [vmem:[#allocation8 + $0x190] ss:$8 sps:$4 sm:$0xff]  }
 0x112   :  { %1646 = vmatpush2.bf16.msra.mxu1 %v3175_v17  ;;  %2111 = vmatprep.subr.bf16.mxu0 %v3186_v20  ;;  %v3276_v17 = vld [vmem:[#allocation8 + $0x194] ss:$8 sps:$4 sm:$0xff]   ;;  %v3277_v20 = vld [vmem:[#allocation8 + $0x180] ss:$8 sps:$4 sm:$0xff]  }
 0x113   :  { %1647 = vmatprep.subr.bf16.mxu1 %v3183_v19  ;;  %v3279_v19 = vld [vmem:[#allocation8 + $0x184] ss:$8 sps:$4 sm:$0xff]  }
 0x116   :  { %1648 = vmatpush2.bf16.msra.mxu1 %v3181_v21 }
 0x117   :  { %2154 = vmatprep.subr.bf16.mxu1 %v3234_v28 }
 0x118   :  { %2720 = vmatmul.mubr.msk.bf16.vlgmr.msra.gmra.mxu0 %vm1355_vm0, %v3556_v14  ;;  %v3240_v14 = vld [vmem:[#allocation8 + $0x154] ss:$8 sps:$4 sm:$0xff]  }
 0x119   :  { %1650 = vmatmul.mubr.bf16.vlgmr.msra.gmra.mxu1 %v3564_v10  ;;  %2112 = vmatpush1.bf16.msra.mxu0 %v3184_v22  ;;  %v3235_v10 = vld [vmem:[#allocation8 + $0x160] ss:$8 sps:$4 sm:$0xff]   ;;  %v320_v22 = vlaneseq }
 0x11a   :  { %2113 = vmatprep.subr.bf16.mxu0 %v3189_v23  ;;  %2155 = vmatpush1.bf16.msra.mxu1 %v3232_v27 }
 0x11b   :  { %2156 = vmatprep.subr.bf16.mxu1 %v3237_v29 }
 0x11d   :  { %2114 = vmatpush1.bf16.msra.mxu0 %v3187_v24  ;;  %v3575_v24 = vshrl.u32 %v320_v22, 7 }
 0x11e   :  { %2115 = vmatprep.subr.bf16.mxu0 %v3192_v25  ;;  %2157 = vmatpush1.bf16.msra.mxu1 %v3235_v10 }
 0x11f   :  { %2158 = vmatprep.subr.bf16.mxu1 %v3240_v14  ;;  %v322_v27 = vsub.s32 0, %v3575_v24 }
 0x121   :  { %2116 = vmatpush1.bf16.msra.mxu0 %v3190_v5 }
 0x122   :  { %2117 = vmatprep.subr.bf16.mxu0 %v3195_v26  ;;  %2159 = vmatpush1.bf16.msra.mxu1 %v3238_v32  ;;  %v326_v26 = vsub.s32 1, %v3575_v24 }
 0x123   :  { %2160 = vmatprep.subr.bf16.mxu1 %v3243_v4 }
 0x125   :  { %2118 = vmatpush1.bf16.msra.mxu0 %v3193_v11  ;;  %v318_v11 = vld [vmem:[#allocation7] sm:$0xf] }
 0x126   :  { %2119 = vmatprep.subr.bf16.mxu0 %v3198_v30  ;;  %2161 = vmatpush1.bf16.msra.mxu1 %v3241_v36  ;;  %v327_v30 = vrot.slane %v318_v11, %v326_v26  ;;  %v323_v10 = vrot.slane %v318_v11, %v322_v27 }
 0x127   :  { %2162 = vmatprep.subr.bf16.mxu1 %v3246_v37 }
 0x129   :  { %2120 = vmatpush1.bf16.msra.mxu0 %v3196_v51 }
 0x12a   :  { %2121 = vmatprep.subr.bf16.mxu0 %v3201_v31  ;;  %2163 = vmatpush1.bf16.msra.mxu1 %v3244_v39 }
 0x12b   :  { %2164 = vmatprep.subr.bf16.mxu1 %v3249_v40 }
 0x12d   :  { %2122 = vmatpush1.bf16.msra.mxu0 %v3199_v34 }
 0x12e   :  { %2123 = vmatprep.subr.bf16.mxu0 %v3204_v35  ;;  %2165 = vmatpush1.bf16.msra.mxu1 %v3247_v43 }
 0x12f   :  { %2166 = vmatprep.subr.bf16.mxu1 %v3252_v44 }
 0x131   :  { %2124 = vmatpush1.bf16.msra.mxu0 %v3202_v38 }
 0x132   :  { %2125 = vmatprep.subr.bf16.mxu0 %v3207_v33  ;;  %2167 = vmatpush1.bf16.msra.mxu1 %v3250_v47 }
 0x133   :  { %2168 = vmatprep.subr.bf16.mxu1 %v3255_v48 }
 0x135   :  { %2126 = vmatpush1.bf16.msra.mxu0 %v3205_v41 }
 0x136   :  { %2127 = vmatprep.subr.bf16.mxu0 %v3210_v42  ;;  %2169 = vmatpush1.bf16.msra.mxu1 %v3253_v52 }
 0x137   :  { %2170 = vmatprep.subr.bf16.mxu1 %v3258_v53 }
 0x139   :  { %2128 = vmatpush2.bf16.msra.mxu0 %v3208_v45 }
 0x13a   :  { %2129 = vmatprep.subr.bf16.mxu0 %v3213_v46  ;;  %2171 = vmatpush2.bf16.msra.mxu1 %v3256_v56 }
 0x13b   :  { %2172 = vmatprep.subr.bf16.mxu1 %v3261_v57 }
 0x13d   :  { %2130 = vmatpush2.bf16.msra.mxu0 %v3211_v49 }
 0x13e   :  { %2131 = vmatprep.subr.bf16.mxu0 %v3216_v50  ;;  %2173 = vmatpush2.bf16.msra.mxu1 %v3259_v60 }
 0x13f   :  { %2174 = vmatprep.subr.bf16.mxu1 %v3264_v61 }
 0x141   :  { %2132 = vmatpush2.bf16.msra.mxu0 %v3214_v54 }
 0x142   :  { %2133 = vmatprep.subr.bf16.mxu0 %v3219_v55  ;;  %2175 = vmatpush2.bf16.msra.mxu1 %v3262_v0  ;;  %v330_v0 = vsub.s32 2, %v3575_v24 }
 0x143   :  { %2176 = vmatprep.subr.bf16.mxu1 %v3267_v8 }
 0x145   :  { %2134 = vmatpush2.bf16.msra.mxu0 %v3217_v58 }
 0x146   :  { %2135 = vmatprep.subr.bf16.mxu0 %v3222_v59  ;;  %2177 = vmatpush2.bf16.msra.mxu1 %v3265_v9 }
 0x147   :  { %2178 = vmatprep.subr.bf16.mxu1 %v3270_v12 }
 0x149   :  { %2136 = vmatpush2.bf16.msra.mxu0 %v3220_v62 }
 0x14a   :  { %2137 = vmatprep.subr.bf16.mxu0 %v3225_v63  ;;  %2179 = vmatpush2.bf16.msra.mxu1 %v3268_v13  ;;  %v334_v63 = vsub.s32 3, %v3575_v24 }
 0x14b   :  { %2180 = vmatprep.subr.bf16.mxu1 %v3273_v15 }
 0x14d   :  { %2138 = vmatpush2.bf16.msra.mxu0 %v3223_v1 }
 0x14e   :  { %2139 = vmatprep.subr.bf16.mxu0 %v3228_v2  ;;  %2181 = vmatpush2.bf16.msra.mxu1 %v3271_v16 }
 0x14f   :  { %2182 = vmatprep.subr.bf16.mxu1 %v3276_v17 }
 0x150   :  { %v1393_v25 = vpop.f32.mrf.mxu0 }
 0x151   :  { %2140 = vmatpush2.bf16.msra.mxu0 %v3226_v3  ;;  %v1436_v21 = vpop.f32.mrf.mxu1  ;;  %v1394_v32 = vadd.f32 %v1393_v25, %v323_v10 }
 0x152   :  { %2141 = vmatprep.subr.bf16.mxu0 %v3231_v6  ;;  %2183 = vmatpush2.bf16.msra.mxu1 %v3274_v18  ;;  %v1395_v28 = vpop.f32.mrf.mxu0  ;;  %v335_v6 = vrot.slane %v318_v11, %v334_v63 }
 0x153   :  { %2184 = vmatprep.subr.bf16.mxu1 %v3279_v19  ;;  %v1438_v23 = vpop.f32.mrf.mxu1  ;;  %v1396_v31 = vadd.f32 %v1395_v28, %v327_v30  ;;  %v1437_v33 = vadd.f32 %v1436_v21, %v1394_v32 }
 0x154   :  { %v1397_v14 = vpop.f32.mrf.mxu0 }
 0x155   :  { %2142 = vmatpush2.bf16.msra.mxu0 %v3229_v7  ;;  %v1440_v5 = vpop.f32.mrf.mxu1  ;;  %v1398_v34 = vadd.f32 %v1397_v14, %v323_v10  ;;  %v1439_v37 = vadd.f32 %v1438_v23, %v1396_v31  ;;  %v331_v7 = vrot.slane %v318_v11, %v330_v0 }
 0x156   :  { %2185 = vmatpush2.bf16.msra.mxu1 %v3277_v20  ;;  %v1399_v4 = vpop.f32.mrf.mxu0 }
 0x157   :  { %v1442_v29 = vpop.f32.mrf.mxu1  ;;  %v1400_v38 = vadd.f32 %v1399_v4, %v327_v30  ;;  %v1441_v40 = vadd.f32 %v1440_v5, %v1398_v34 }
 0x159   :  { %v1522_v51 = vpop.f32.mrf.mxu1  ;;  %v1443_v45 = vadd.f32 %v1442_v29, %v1400_v38 }
 0x15b   :  { %v1524_v35 = vpop.f32.mrf.mxu1 }
 0x15d   :  { %v1526_v42 = vpop.f32.mrf.mxu1 }
 0x15f   :  { %v1528_v52 = vpop.f32.mrf.mxu1 }
 0x190   :  { %v1479_v36 = vpop.f32.mrf.mxu0 }
 0x191   :  { %v1480_v43 = vadd.f32 %v1479_v36, %v1437_v33 }
 0x192   :  { %v1481_v39 = vpop.f32.mrf.mxu0 }
 0x193   :  { %v1482_v41 = vadd.f32 %v1481_v39, %v1439_v37  ;;  %v1523_v53 = vadd.f32 %v1522_v51, %v1480_v43  ;;  %v3282_v43 = vld [vmem:[#allocation10 + $0x70] sm:$0xff]  }
 0x194   :  { %v1483_v44 = vpop.f32.mrf.mxu0 }
 0x195   :  { %v1484_v46 = vadd.f32 %v1483_v44, %v1441_v40  ;;  %v1525_v48 = vadd.f32 %v1524_v35, %v1482_v41  ;;  %v1703_v58 = vmax.f32 %v1523_v53, 0.0  ;;  %v3280_v41 = vld [vmem:[#allocation10 + $0x78] sm:$0xff]   ;;  %v3283_v44 = vld [vmem:[#allocation10 + $0x30] sm:$0xff]  }
 0x196   :  { %v1485_v47 = vpop.f32.mrf.mxu0  ;;  %2811 = vmatprep.subr.bf16.mxu0 %v3280_v41  ;;  %v3291_v53 = vld [vmem:[#allocation10 + $0x10] sm:$0xff]  }
 0x197   :  { %v1527_v49 = vadd.f32 %v1526_v42, %v1484_v46  ;;  %v1486_v50 = vadd.f32 %v1485_v47, %v1443_v45  ;;  %v1704_v56 = vmax.f32 %v1525_v48, 0.0  ;;  %v3281_v42 = vld [vmem:[#allocation10 + $0x38] sm:$0xff]   ;;  %v3284_v45 = vld [vmem:[#allocation10 + $0x68] sm:$0xff]   ;;  %v3286_v47 = vld [vmem:[#allocation10 + $0x60] sm:$0xff]  }
 0x198   :  { %v3285_v46 = vld [vmem:[#allocation10 + $0x28] sm:$0xff]   ;;  %v3287_v48 = vld [vmem:[#allocation10 + $0x20] sm:$0xff]  }
 0x199   :  { %v1529_v54 = vadd.f32 %v1528_v52, %v1486_v50  ;;  %v1707_v55 = vmax.f32 %v1527_v49, 0.0  ;;  %v1565_v61 = vpop.f32.mrf.mxu1  ;;  %v3288_v49 = vld [vmem:[#allocation10 + $0x58] sm:$0xff]   ;;  %v3290_v52 = vld [vmem:[#allocation10 + $0x50] sm:$0xff]  }
 0x19a   :  { %v1566_v15 = vadd.f32 %v1565_v61, %v331_v7  ;;  %v3289_v50 = vld [vmem:[#allocation10 + $0x18] sm:$0xff]   ;;  %v3298_v61 = vld [vmem:[#allocation11 + $0x28] sm:$0xff]  }
 0x19b   :  { %v1708_v57 = vmax.f32 %v1529_v54, 0.0  ;;  %v1711_v60 = vpack.c.bf16 %v1707_v55, %v1703_v58  ;;  %v1567_v62 = vpop.f32.mrf.mxu1  ;;  %v3292_v54 = vld [vmem:[#allocation10 + $0x48] sm:$0xff]   ;;  %v3296_v58 = vld [vmem:[#allocation11 + $0x38] sm:$0xff]  }
 0x19c   :  { %v1568_v13 = vadd.f32 %v1567_v62, %v335_v6  ;;  %v3293_v55 = vld [vmem:[#allocation10 + $0x8] sm:$0xff]   ;;  %v3299_v62 = vld [vmem:[#allocation11 + $0x20] sm:$0xff]  }
 0x19d   :  { %v1712_v59 = vpack.c.bf16 %v1708_v57, %v1704_v56  ;;  %v1569_v2 = vpop.f32.mrf.mxu1  ;;  %v3294_v56 = vld [vmem:[#allocation10 + $0x40] sm:$0xff]  }
 0x19e   :  { %v1570_v18 = vadd.f32 %v1569_v2, %v331_v7  ;;  %v3295_v57 = vld [vmem:[#allocation10] sm:$0xff]  }
 0x19f   :  { %2143 = vmatprep.mubr.bf16.mxu0 %v1712_v59  ;;  %v1571_v9 = vpop.f32.mrf.mxu1  ;;  %v3469_v59 = vmov 0.0  }
 0x1a0   :  { %2144 = vmatmul.mubr.bf16.vlgmr.msra.gmra.mxu0 %v1711_v60  ;;  %v1572_v23 = vadd.f32 %v1571_v9, %v335_v6  ;;  %2842 = vmatprep.subr.bf16.mxu1 %v3469_v59  ;;  %v3297_v60 = vld [vmem:[#allocation11 + $0x30] sm:$0xff]  }
 0x1a1   :  { %2812 = vmatpush3.bf16.msra.mxu0 %v3281_v42 }
 0x1a2   :  { %2813 = vmatprep.subr.bf16.mxu0 %v3282_v43 }
 0x1a5   :  { %2814 = vmatpush3.bf16.msra.mxu0 %v3283_v44 }
 0x1a6   :  { %2815 = vmatprep.subr.bf16.mxu0 %v3284_v45 }
 0x1a9   :  { %2816 = vmatpush3.bf16.msra.mxu0 %v3285_v46 }
 0x1aa   :  { %2817 = vmatprep.subr.bf16.mxu0 %v3286_v47 }
 0x1ad   :  { %2818 = vmatpush3.bf16.msra.mxu0 %v3287_v48 }
 0x1ae   :  { %2819 = vmatprep.subr.bf16.mxu0 %v3288_v49 }
 0x1b1   :  { %2820 = vmatpush3.bf16.msra.mxu0 %v3289_v50 }
 0x1b2   :  { %2821 = vmatprep.subr.bf16.mxu0 %v3290_v52 }
 0x1b5   :  { %2822 = vmatpush3.bf16.msra.mxu0 %v3291_v53 }
 0x1b6   :  { %2823 = vmatprep.subr.bf16.mxu0 %v3292_v54 }
 0x1b9   :  { %2824 = vmatpush3.bf16.msra.mxu0 %v3293_v55 }
 0x1ba   :  { %2825 = vmatprep.subr.bf16.mxu0 %v3294_v56 }
 0x1bd   :  { %2826 = vmatpush3.bf16.msra.mxu0 %v3295_v57 }
 0x1d0   :  { %v1608_v1 = vpop.f32.mrf.mxu0 }
 0x1d1   :  { %v1609_v20 = vadd.f32 %v1608_v1, %v1566_v15  ;;  %v1779_v1 = vld [vmem:[%s3608_s4] sm:$0x3] }
 0x1d2   :  { %v1610_v3 = vpop.f32.mrf.mxu0  ;;  %v1784_v6 = vrot.slane %v1779_v1, %v322_v27  ;;  %v3300_v27 = vld [vmem:[#allocation11 + $0x18] sm:$0xff]  }
 0x1d3   :  { %v1611_v19 = vadd.f32 %v1610_v3, %v1568_v13  ;;  %v1788_v3 = vrot.slane %v1779_v1, %v326_v26 }
 0x1d4   :  { %v1612_v8 = vpop.f32.mrf.mxu0 }
 0x1d5   :  { %v1613_v25 = vadd.f32 %v1612_v8, %v1570_v18 }
 0x1d6   :  { %v1614_v12 = vpop.f32.mrf.mxu0 }
 0x1d7   :  { %v1615_v10 = vadd.f32 %v1614_v12, %v1572_v23 }
 0x1d8   :  { %v1694_v17 = vpop.f32.mrf.mxu0 }
 0x1d9   :  { %v1651_v16 = vpop.f32.mrf.mxu1 }
 0x1da   :  { %v1696_v22 = vpop.f32.mrf.mxu0  ;;  %v1652_v28 = vadd.f32 %v1651_v16, %v1609_v20 }
 0x1db   :  { %v1653_v21 = vpop.f32.mrf.mxu1 }
 0x1dc   :  { %v1654_v5 = vadd.f32 %v1653_v21, %v1611_v19  ;;  %v1698_v30 = vpop.f32.mrf.mxu0  ;;  %v1695_v34 = vadd.f32 %v1694_v17, %v1652_v28 }
 0x1dd   :  { %v1655_v29 = vpop.f32.mrf.mxu1 }
 0x1de   :  { %v1656_v11 = vadd.f32 %v1655_v29, %v1613_v25  ;;  %v1700_v51 = vpop.f32.mrf.mxu0  ;;  %v1697_v31 = vadd.f32 %v1696_v22, %v1654_v5  ;;  %v1705_v33 = vmax.f32 %v1695_v34, 0.0  ;;  %v3301_v29 = vld [vmem:[#allocation11 + $0x10] sm:$0xff]  }
 0x1df   :  { %v1657_v14 = vpop.f32.mrf.mxu1 }
 0x1e0   :  { %v1699_v32 = vadd.f32 %v1698_v30, %v1656_v11  ;;  %v1658_v4 = vadd.f32 %v1657_v14, %v1615_v10  ;;  %v1706_v37 = vmax.f32 %v1697_v31, 0.0  ;;  %v3302_v30 = vld [vmem:[#allocation11 + $0x8] sm:$0xff]   ;;  %v3303_v10 = vld [vmem:[#allocation11] sm:$0xff]  }
 0x1e1   :  { %v2785_v31 = vld [vmem:[%s3610_s6] ss:$0 sm:$0xff]  ;;  %s3424_s6 = scalar_lea.vmem %s2502_s27, 256 }
 0x1e2   :  { %v1701_v35 = vadd.f32 %v1700_v51, %v1658_v4  ;;  %v1709_v36 = vmax.f32 %v1699_v32, 0.0  ;;  %p3425_p2 = scmp.ne.s32.totalorder %s2502_s27, %s3424_s6  ;;  %p3430_p4 = scmp.lt.s32.totalorder %s3424_s6, %s3424_s6 }
 0x1e4   :  { %v1710_v38 = vmax.f32 %v1701_v35, 0.0  ;;  %v1713_v40 = vpack.c.bf16 %v1709_v36, %v1705_v33  ;;  %p3431_p5 = por %p3430_p4, %p3429_p3 }
 0x1e6   :  { %v1714_v39 = vpack.c.bf16 %v1710_v38, %v1706_v37  ;;  %p3432_p6 = pnand %p3431_p5, %p3425_p2 }
 0x1e8   :  { %2186 = vmatprep.mubr.bf16.mxu1 %v1714_v39  ;;  %v2802_v39 = vld [vmem:[%s3612_s8] ss:$0 sm:$0xff] }
 0x1e9   :  { %2187 = vmatmul.mubr.bf16.vlgmr.msra.gmra.mxu1 %v1713_v40 }
 0x1ea   :  { %2843 = vmatpush3.bf16.msra.mxu1 %v3296_v58  ;;  %2858 = vmatprep.mubr.msk.bf16.mxu1 %vm3470_vm1, %v3469_v59 }
 0x1eb   :  { %2844 = vmatprep.subr.bf16.mxu1 %v3469_v59 }
 0x1ee   :  { %2845 = vmatpush3.bf16.msra.mxu1 %v3297_v60 }
 0x1ef   :  { %2846 = vmatprep.subr.bf16.mxu1 %v3469_v59 }
 0x1f2   :  { %2847 = vmatpush3.bf16.msra.mxu1 %v3298_v61 }
 0x1f3   :  { %2848 = vmatprep.subr.bf16.mxu1 %v3469_v59 }
 0x1f6   :  { %2849 = vmatpush3.bf16.msra.mxu1 %v3299_v62 }
 0x1f7   :  { %2850 = vmatprep.subr.bf16.mxu1 %v3469_v59 }
 0x1fa   :  { %2851 = vmatpush3.bf16.msra.mxu1 %v3300_v27 }
 0x1fb   :  { %2852 = vmatprep.subr.bf16.mxu1 %v3469_v59 }
 0x1fe   :  { %2853 = vmatpush3.bf16.msra.mxu1 %v3301_v29 }
 0x1ff   :  { %2854 = vmatprep.subr.bf16.mxu1 %v3469_v59 }
 0x202   :  { %2855 = vmatpush3.bf16.msra.mxu1 %v3302_v30 }
 0x203   :  { %2856 = vmatprep.subr.bf16.mxu1 %v3469_v59 }
 0x206   :  { %2857 = vmatpush3.bf16.msra.mxu1 %v3303_v10 }
 0x260   :  { %v2145_v63 = vpop.f32.mrf.mxu0 }
 0x261   :  { %v2146_v15 = vadd.f32 %v2145_v63, %v1784_v6 }
 0x262   :  { %v2147_v0 = vpop.f32.mrf.mxu0 }
 0x263   :  { %v2148_v12 = vadd.f32 %v2147_v0, %v1788_v3 }
 0x264   :  { %v2149_v2 = vpop.f32.mrf.mxu0 }
 0x265   :  { %v2150_v13 = vadd.f32 %v2149_v2, %v1784_v6 }
 0x266   :  { %v2151_v8 = vpop.f32.mrf.mxu0 }
 0x267   :  { %v2152_v17 = vadd.f32 %v2151_v8, %v1788_v3 }
 0x2a9   :  { %v2188_v7 = vpop.f32.mrf.mxu1 }
 0x2aa   :  { %v2189_v20 = vadd.f32 %v2188_v7, %v2146_v15 }
 0x2ab   :  { %v2190_v9 = vpop.f32.mrf.mxu1 }
 0x2ac   :  { %v2191_v18 = vadd.f32 %v2190_v9, %v2148_v12  ;;  %v2197_v26 = vmax.f32 %v2189_v20, 0.0 }
 0x2ad   :  { %v2192_v16 = vpop.f32.mrf.mxu1 }
 0x2ae   :  { %v2193_v19 = vadd.f32 %v2192_v16, %v2150_v13  ;;  %v2198_v25 = vmax.f32 %v2191_v18, 0.0 }
 0x2af   :  { %v2194_v21 = vpop.f32.mrf.mxu1 }
 0x2b0   :  { %v2195_v22 = vadd.f32 %v2194_v21, %v2152_v17  ;;  %v2199_v23 = vmax.f32 %v2193_v19, 0.0 }
 0x2b2   :  { %v2200_v5 = vmax.f32 %v2195_v22, 0.0  ;;  %v2201_v24 = vpack.c.bf16 %v2199_v23, %v2197_v26 }
 0x2b4   :  { %v2202_v28 = vpack.c.bf16 %v2200_v5, %v2198_v25 }
 0x2b6   :  { %2370 = vmatprep.mubr.bf16.mxu0 %v2202_v28 }
 0x2b7   :  { %2371 = vmatmul.mubr.bf16.vlgmr.msra.gmra.mxu0 %v2201_v24 }
 0x377   :  { %v2827_v11 = vpop.f32.mrf.mxu0 }
 0x379   :  { %v2828_v14 = vpop.f32.mrf.mxu0 }
 0x37a   :  { %v2829_v51 = vadd.f32 %v2828_v14, %v2827_v11 }
 0x37b   :  { %v2830_v32 = vpop.f32.mrf.mxu0 }
 0x37c   :  { %v2373_v34 = vadd.f32 %v2829_v51, %v2785_v31 }
 0x37d   :  { %v2831_v4 = vpop.f32.mrf.mxu0 }
 0x37e   :  { %v2832_v35 = vadd.f32 %v2831_v4, %v2830_v32  ;;  %v2379_v37 = vmax.f32 %v2373_v34, 0.0 }
 0x380   :  { %v2376_v36 = vadd.f32 %v2832_v35, %v2785_v31 }
 0x382   :  { %v2380_v38 = vmax.f32 %v2376_v36, 0.0 }
 0x384   :  { %v2381_v33 = vpack.c.bf16 %v2380_v38, %v2379_v37 }
 0x386   :  { %2859 = vmatmul.mubr.bf16.vlgmr.msra.gmra.mxu1 %v2381_v33 }
 0x446   :  { %v2487_v40 = vpop.f32.mrf.mxu1 }
 0x447   :  { %v2488_v41 = vadd.f32 %v2802_v39, %v2487_v40 }
 0x448   :  { %v2860_v42 = vpop.f32.mrf.mxu1 }
 0x449   :  { %2494 = vst [vmem:[#allocation13] sm:$0xff] %v2488_v41 }
 0x44a   :  { %v2490_v43 = vpop.f32.mrf.mxu1 }
 0x44b   :  { %v2491_v44 = vadd.f32 %v2802_v39, %v2490_v43 }
 0x44c   :  { %v2861_v45 = vpop.f32.mrf.mxu1 }
 0x44d   :  { %2495 = vst [vmem:[#allocation13 + $0x8] sm:$0xff] %v2491_v44 }
 0x44e   :  { %3435 = shalt.err (!%p3432_p6)
}
 0x44f   :  { %2507 = dma.vmem_to_hbm [thread:$0]  %s2502_s27, 256, %s3613_s9, [#allocation4], %s3458_s19, %s3458_s19, %s3459_s20  }
 0x450   :  { %3452 = dma.done.wait [#allocation4], 256  }
 0x451   :  { %3453 = vsyncadd [#allocation4], 4294967040 }
 0x452   :  { %2511 = vsyncpa [#allocation3], 1 }
 0x453   :  { %2512 = vsyncpa [#allocation6], 1 }
 0x454   :  { %2513 = vsyncpa [#allocation9], 1 }
 0x455   :  { %2514 = vsyncpa [#allocation12], 1 }
 0x456   :  { %2515 = vsyncpa [#allocation4], 1 }

</bundles_post_ra>
